<compile_context>
chip_gen: v5e
topology: v5e:2x2
jax: 0.10.0
libtpu: 0.0.40
codegen_flags: <defaults>
</compile_context>

<pallas_src>
import functools

import jax
import jax.numpy as jnp
from jax.experimental import pallas as pl
from jax.experimental.pallas import tpu as pltpu


def _round_up(x, m):
    return ((x + m - 1) // m) * m


def _attention_kernel(x_ref, gamma_ref, beta_ref, wq_ref, wkv_ref, wo_ref,
                      o_ref, xn_scr, k_scr, v_scr, *, heads, dim_head, dh_pad, tq, eps=1e-5):
    # x_ref  : (n, dim)      bf16  full sequence of this batch element
    # o_ref  : (tq, dim_pad)       lane-dense output tile
    # xn_scr : (n, dim)      bf16  LayerNorm(x), persisted across query tiles
    # k_scr  : (n, dh_pad)   bf16  K * 1/sqrt(d), persisted across query tiles
    # v_scr  : (n, dh_pad)   bf16  V, persisted across query tiles
    qi = pl.program_id(1)
    scale = dim_head ** (-0.5)

    # --- once per batch element: LayerNorm + shared K/V projection into VMEM scratch ---
    @pl.when(qi == 0)
    def _():
        gamma = gamma_ref[0].astype(jnp.float32)
        beta = beta_ref[0].astype(jnp.float32)
        xf = x_ref[...].astype(jnp.float32)                    # LN statistics in f32
        mean = jnp.mean(xf, axis=-1, keepdims=True)
        var = jnp.mean(jnp.square(xf - mean), axis=-1, keepdims=True)
        xn = ((xf - mean) * jax.lax.rsqrt(var + eps) * gamma + beta).astype(jnp.bfloat16)
        xn_scr[...] = xn
        kv = jnp.dot(xn, wkv_ref[...], preferred_element_type=jnp.float32)   # (n, 2*dh_pad) f32
        k_scr[...] = (kv[:, :dh_pad] * scale).astype(jnp.bfloat16)           # fold 1/sqrt(d) into K
        v_scr[...] = kv[:, dh_pad:].astype(jnp.bfloat16)

    # --- query tile: sliced from the resident normalized sequence (no second x stream) ---
    i0 = pl.multiple_of(qi * tq, tq)
    xq = xn_scr[pl.ds(i0, tq), :]                                            # (tq, dim) bf16
    q = jnp.dot(xq, wq_ref[...], preferred_element_type=jnp.float32)         # (tq, heads*dh_pad)
    q = q.astype(jnp.bfloat16).reshape(tq * heads, dh_pad)                   # heads folded into rows

    # --- attention: one bf16 MXU pass for all heads (single shared KV head), f32 accumulation ---
    sim = jax.lax.dot_general(q, k_scr[...], (((1,), (1,)), ((), ())),
                              preferred_element_type=jnp.float32)            # (tq*heads, n) f32
    m = jnp.max(sim, axis=-1, keepdims=True)
    p = jnp.exp(sim - m)
    attn = (p * pl.reciprocal(jnp.sum(p, axis=-1, keepdims=True), approx=True)
            ).astype(jnp.bfloat16)
    # (attention dropout is identity in eval mode)
    out = jnp.dot(attn, v_scr[...], preferred_element_type=jnp.float32)      # (tq*heads, dh_pad)

    # --- merge heads + output projection (head- and lane-padded W_out; pads are exact zeros) ---
    out = out.astype(jnp.bfloat16).reshape(tq, heads * dh_pad)
    out = jnp.dot(out, wo_ref[...], preferred_element_type=jnp.float32)      # (tq, dim_pad)
    o_ref[...] = out.astype(o_ref.dtype)


def _vmem_capacity_bytes():
    try:
        return int(pltpu.get_tpu_info().vmem_capacity_bytes)
    except Exception:
        return 64 * 1024 * 1024          # conservative fallback: v7x per-core VMEM


def _pick_query_tile(n, heads, score_budget_bytes, cap=512):
    """Largest tq (multiple of 8, divides n, <= cap) whose live f32 score tiles
    (sim + p, each tq*heads*n*4 bytes) fit the budget; else smallest legal tile."""
    best = None
    smallest = None
    for t in range(8, min(n, cap) + 1, 8):
        if n % t:
            continue
        if smallest is None:
            smallest = t
        if 2 * t * heads * n * 4 <= score_budget_bytes:
            best = t
    if best is not None:
        return best
    if smallest is not None:
        return smallest
    return n        # no multiple of 8 divides n: fall back to a single full-sequence tile


def transformer_attention(x, gamma, beta, wq, wkv, wo, *, heads):
    """x: (b, n, dim); gamma/beta: (1, dim); wq: (dim, h*dh); wkv: (dim, 2*dh); wo: (h*dh, dim)."""
    b, n, dim = x.shape
    inner_dim = wq.shape[1]
    assert inner_dim % heads == 0
    dim_head = inner_dim // heads
    assert wkv.shape == (dim, 2 * dim_head)
    assert wo.shape == (inner_dim, dim)

    # bf16 streams (module's LayerNorm casts x to bf16 anyway): halves x DMA.
    x = x.astype(jnp.bfloat16)
    gamma = gamma.astype(jnp.bfloat16)
    beta = beta.astype(jnp.bfloat16)

    # Pad per-head width to a multiple of 128: lane-dense MXU contraction/output dims,
    # tile-aligned K/V column split and head-fold reshapes. Zero padding is exact.
    dh_pad = _round_up(dim_head, 128)
    inner_pad = heads * dh_pad
    wq_p = jnp.pad(wq.astype(jnp.bfloat16).reshape(dim, heads, dim_head),
                   ((0, 0), (0, 0), (0, dh_pad - dim_head))).reshape(dim, inner_pad)
    wk, wv = wkv[:, :dim_head], wkv[:, dim_head:]
    wkv_p = jnp.concatenate(
        [jnp.pad(wk.astype(jnp.bfloat16), ((0, 0), (0, dh_pad - dim_head))),
         jnp.pad(wv.astype(jnp.bfloat16), ((0, 0), (0, dh_pad - dim_head)))], axis=-1)

    # Lane-dense output: pad W_out rows (head padding) and output features to 128.
    dim_pad = _round_up(dim, 128)
    wo_p = jnp.pad(wo.astype(jnp.bfloat16).reshape(heads, dim_head, dim),
                   ((0, 0), (0, dh_pad - dim_head), (0, dim_pad - dim))).reshape(inner_pad, dim_pad)

    # Generation-aware sizing: scoped VMEM limit and score-tile budget from this chip's VMEM.
    vmem_cap = _vmem_capacity_bytes()
    vmem_limit = min((vmem_cap * 3) // 4, 100 * 1024 * 1024)
    score_budget = min(vmem_limit // 4, 16 * 1024 * 1024)
    tq = _pick_query_tile(n, heads, score_budget)
    num_q = max(n // tq, 1)

    kernel = functools.partial(_attention_kernel, heads=heads, dim_head=dim_head,
                               dh_pad=dh_pad, tq=tq)

    # Cost estimate: K/V computed once per batch element, x streamed from HBM once.
    flops = 2 * b * (n * dim * inner_pad           # q projection
                     + n * dim * 2 * dh_pad        # kv projection (once per batch)
                     + 2 * heads * n * n * dh_pad  # q@k^T and attn@v
                     + n * inner_pad * dim_pad)    # output projection
    bytes_accessed = 2 * (x.size + gamma.size + beta.size + wq_p.size + wkv_p.size
                          + wo_p.size + b * n * dim_pad)        # bf16 = 2 bytes
    cost = pl.CostEstimate(flops=int(flops),
                           transcendentals=int(b * heads * n * n),
                           bytes_accessed=int(bytes_accessed))

    def call(single_buffer_weights):
        def const_spec(shape):
            # Constant-index-map blocks: single-buffer to halve their VMEM footprint.
            if single_buffer_weights:
                return pl.BlockSpec(shape, lambda bi, qi: (0, 0),
                                    pipeline_mode=pl.Buffered(1))
            return pl.BlockSpec(shape, lambda bi, qi: (0, 0))

        return pl.pallas_call(
            kernel,
            out_shape=jax.ShapeDtypeStruct((b, n, dim_pad), jnp.bfloat16),
            grid_spec=pltpu.PrefetchScalarGridSpec(
                num_scalar_prefetch=0,
                grid=(b, num_q),
                in_specs=[
                    # x: full sequence per batch element; block index constant over qi so it is
                    # DMA'd once per batch (default double-buffering lets the next batch prefetch).
                    pl.BlockSpec((None, n, dim), lambda bi, qi: (bi, 0, 0)),
                    const_spec((1, dim)),                  # gamma
                    const_spec((1, dim)),                  # beta
                    const_spec((dim, inner_pad)),          # W_q   (head-padded)
                    const_spec((dim, 2 * dh_pad)),         # W_kv  (head-padded)
                    const_spec((inner_pad, dim_pad)),      # W_out (head- and lane-padded)
                ],
                out_specs=pl.BlockSpec((None, tq, dim_pad), lambda bi, qi: (bi, qi, 0)),
                scratch_shapes=[
                    pltpu.VMEM((n, dim), jnp.bfloat16),     # LayerNorm(x), reused by all q tiles
                    pltpu.VMEM((n, dh_pad), jnp.bfloat16),  # K * 1/sqrt(d)
                    pltpu.VMEM((n, dh_pad), jnp.bfloat16),  # V
                ],
            ),
            compiler_params=pltpu.CompilerParams(
                # qi must be 'arbitrary': K/V scratch is filled at qi==0 and reused afterwards.
                # batch stays 'parallel' -> megacore axis on v7x (each core has its own scratch).
                dimension_semantics=("parallel", "arbitrary"),
                vmem_limit_bytes=int(vmem_limit)),
            cost_estimate=cost,
        )(x, gamma, beta, wq_p, wkv_p, wo_p)

    try:
        out = call(single_buffer_weights=True)
    except Exception:
        # pipeline_mode=pl.Buffered(1) not supported on this jax version: plain specs.
        out = call(single_buffer_weights=False)

    return out[..., :dim] if dim_pad != dim else out


def _reference(x, gamma, beta, wq, wkv, wo, *, heads):
    """Pure-JAX reference (f32) mirroring the PyTorch forward (eval mode)."""
    b, n, dim = x.shape
    inner_dim = wq.shape[1]
    dim_head = inner_dim // heads
    xf = x.astype(jnp.bfloat16).astype(jnp.float32)       # module casts to bf16 before LN
    mean = jnp.mean(xf, axis=-1, keepdims=True)
    var = jnp.mean(jnp.square(xf - mean), axis=-1, keepdims=True)
    xn = (xf - mean) / jnp.sqrt(var + 1e-5)
    xn = xn * gamma.astype(jnp.float32)[0] + beta.astype(jnp.float32)[0]
    xn = xn.astype(jnp.bfloat16).astype(jnp.float32)
    q = xn @ wq.astype(jnp.float32)                       # (b, n, h*d)
    kv = xn @ wkv.astype(jnp.float32)                     # (b, n, 2d)
    k, v = kv[..., :dim_head], kv[..., dim_head:]
    q = q.reshape(b, n, heads, dim_head).transpose(0, 2, 1, 3) * (dim_head ** -0.5)
    sim = jnp.einsum('bhid,bjd->bhij', q, k)
    attn = jax.nn.softmax(sim, axis=-1)
    out = jnp.einsum('bhij,bjd->bhid', attn, v)
    out = out.transpose(0, 2, 1, 3).reshape(b, n, heads * dim_head)
    return out.astype(jnp.bfloat16).astype(jnp.float32) @ wo.astype(jnp.float32)


if __name__ == "__main__":
    b, n, dim, heads = 2, 8, 32, 4
    dim_head = dim // heads          # 8
    inner_dim = dim_head * heads     # 32

    key = jax.random.PRNGKey(0)
    kx, kq, kkv, ko = jax.random.split(key, 4)

    x = jax.random.normal(kx, (b, n, dim), dtype=jnp.float32)
    gamma = jnp.ones((1, dim), dtype=jnp.bfloat16)       # LayerNorm.gamma init = ones
    beta = jnp.zeros((1, dim), dtype=jnp.bfloat16)       # LayerNorm.beta buffer = zeros
    wq = (0.05 * jax.random.normal(kq, (dim, inner_dim))).astype(jnp.bfloat16)
    wkv = (0.05 * jax.random.normal(kkv, (dim, 2 * dim_head))).astype(jnp.bfloat16)
    wo = (0.05 * jax.random.normal(ko, (inner_dim, dim))).astype(jnp.bfloat16)

    out = transformer_attention(x, gamma, beta, wq, wkv, wo, heads=heads)
    out = jax.block_until_ready(out)

    ref = _reference(x, gamma, beta, wq, wkv, wo, heads=heads)
    assert out.shape == (b, n, dim) and out.dtype == jnp.bfloat16
    err = float(jnp.max(jnp.abs(out.astype(jnp.float32) - ref)))
    assert jnp.allclose(out.astype(jnp.float32), ref, atol=5e-2, rtol=5e-2), err

    print("KERNEL_OK")
</pallas_src>

<mosaic_0001>
module attributes {stable_mosaic.version = 11 : i64} {
  func.func @_attention_kernel(%arg0: i32, %arg1: i32, %arg2: memref<1x8x32xbf16, #tpu.memory_space<vmem>>, %arg3: memref<1x32xbf16, #tpu.memory_space<vmem>>, %arg4: memref<1x32xbf16, #tpu.memory_space<vmem>>, %arg5: memref<32x512xbf16, #tpu.memory_space<vmem>>, %arg6: memref<32x256xbf16, #tpu.memory_space<vmem>>, %arg7: memref<512x128xbf16, #tpu.memory_space<vmem>>, %arg8: memref<1x8x128xbf16, #tpu.memory_space<vmem>>, %arg9: memref<8x32xbf16, #tpu.memory_space<vmem>>, %arg10: memref<8x128xbf16, #tpu.memory_space<vmem>>, %arg11: memref<8x128xbf16, #tpu.memory_space<vmem>>) attributes {dimension_semantics = [#tpu.dimension_semantics<parallel>, #tpu.dimension_semantics<arbitrary>], iteration_bounds = array<i64: 2, 1>, scalar_prefetch = 0 : i64, scratch_operands = 3 : i64, tpu.core_type = #tpu.core_type<tc>, window_params = [{transform_indices = @transform_0, window_bounds = array<i64: 1, 8, 32>}, {pipeline_mode = #tpu.pipeline_mode<synchronous>, transform_indices = @transform_1, window_bounds = array<i64: 1, 32>}, {pipeline_mode = #tpu.pipeline_mode<synchronous>, transform_indices = @transform_2, window_bounds = array<i64: 1, 32>}, {pipeline_mode = #tpu.pipeline_mode<synchronous>, transform_indices = @transform_3, window_bounds = array<i64: 32, 512>}, {pipeline_mode = #tpu.pipeline_mode<synchronous>, transform_indices = @transform_4, window_bounds = array<i64: 32, 256>}, {pipeline_mode = #tpu.pipeline_mode<synchronous>, transform_indices = @transform_5, window_bounds = array<i64: 512, 128>}, {transform_indices = @transform_6, window_bounds = array<i64: 1, 8, 128>}]} {
    %c0_i32 = arith.constant 0 : i32
    %0 = arith.cmpi eq, %arg1, %c0_i32 : i32
    %1 = arith.extui %0 : i1 to i32
    %c0_i32_0 = arith.constant 0 : i32
    %2 = arith.cmpi ne, %1, %c0_i32_0 : i32
    scf.if %2 {
      %c0_17 = arith.constant 0 : index
      %c0_18 = arith.constant 0 : index
      %34 = vector.load %arg3[%c0_17, %c0_18] : memref<1x32xbf16, #tpu.memory_space<vmem>>, vector<1x32xbf16>
      %35 = vector.shape_cast %34 : vector<1x32xbf16> to vector<32xbf16>
      %36 = arith.extf %35 : vector<32xbf16> to vector<32xf32>
      %c0_19 = arith.constant 0 : index
      %c0_20 = arith.constant 0 : index
      %37 = vector.load %arg4[%c0_19, %c0_20] : memref<1x32xbf16, #tpu.memory_space<vmem>>, vector<1x32xbf16>
      %38 = vector.shape_cast %37 : vector<1x32xbf16> to vector<32xbf16>
      %39 = arith.extf %38 : vector<32xbf16> to vector<32xf32>
      %c0_21 = arith.constant 0 : index
      %c0_22 = arith.constant 0 : index
      %c0_23 = arith.constant 0 : index
      %40 = vector.load %arg2[%c0_21, %c0_22, %c0_23] : memref<1x8x32xbf16, #tpu.memory_space<vmem>>, vector<1x8x32xbf16>
      %41 = vector.shape_cast %40 : vector<1x8x32xbf16> to vector<8x32xbf16>
      %42 = arith.extf %41 : vector<8x32xbf16> to vector<8x32xf32>
      %cst_24 = arith.constant dense<0.000000e+00> : vector<8xf32>
      %43 = vector.multi_reduction <add>, %42, %cst_24 [1] : vector<8x32xf32> to vector<8xf32>
      %44 = vector.shape_cast %43 : vector<8xf32> to vector<8x1xf32>
      %cst_25 = arith.constant 3.200000e+01 : f32
      %45 = vector.broadcast %cst_25 : f32 to vector<8x1xf32>
      %46 = arith.divf %44, %45 : vector<8x1xf32>
      %47 = vector.broadcast %46 : vector<8x1xf32> to vector<8x32xf32>
      %48 = arith.subf %42, %47 : vector<8x32xf32>
      %49 = arith.mulf %48, %48 : vector<8x32xf32>
      %cst_26 = arith.constant dense<0.000000e+00> : vector<8xf32>
      %50 = vector.multi_reduction <add>, %49, %cst_26 [1] : vector<8x32xf32> to vector<8xf32>
      %51 = vector.shape_cast %50 : vector<8xf32> to vector<8x1xf32>
      %cst_27 = arith.constant 3.200000e+01 : f32
      %52 = vector.broadcast %cst_27 : f32 to vector<8x1xf32>
      %53 = arith.divf %51, %52 : vector<8x1xf32>
      %54 = vector.broadcast %46 : vector<8x1xf32> to vector<8x32xf32>
      %55 = arith.subf %42, %54 : vector<8x32xf32>
      %cst_28 = arith.constant 9.99999974E-6 : f32
      %56 = vector.broadcast %cst_28 : f32 to vector<8x1xf32>
      %57 = arith.addf %53, %56 : vector<8x1xf32>
      %58 = math.rsqrt %57 : vector<8x1xf32>
      %59 = vector.broadcast %58 : vector<8x1xf32> to vector<8x32xf32>
      %60 = arith.mulf %55, %59 : vector<8x32xf32>
      %61 = vector.shape_cast %36 : vector<32xf32> to vector<1x32xf32>
      %62 = vector.broadcast %61 : vector<1x32xf32> to vector<8x32xf32>
      %63 = arith.mulf %60, %62 : vector<8x32xf32>
      %64 = vector.shape_cast %39 : vector<32xf32> to vector<1x32xf32>
      %65 = vector.broadcast %64 : vector<1x32xf32> to vector<8x32xf32>
      %66 = arith.addf %63, %65 : vector<8x32xf32>
      %67 = arith.truncf %66 : vector<8x32xf32> to vector<8x32xbf16>
      %c0_29 = arith.constant 0 : index
      %c0_30 = arith.constant 0 : index
      %68 = vector.load %arg9[%c0_29, %c0_30] : memref<8x32xbf16, #tpu.memory_space<vmem>>, vector<8x32xbf16>
      tpu.vector_store %arg9[%c0_29, %c0_30], %67 {strides = array<i32>} : memref<8x32xbf16, #tpu.memory_space<vmem>>, vector<8x32xbf16>,
      %c0_31 = arith.constant 0 : index
      %c0_32 = arith.constant 0 : index
      %69 = vector.load %arg6[%c0_31, %c0_32] : memref<32x256xbf16, #tpu.memory_space<vmem>>, vector<32x256xbf16>
      %cst_33 = arith.constant dense<0.000000e+00> : vector<8x256xf32>
      %70 = tpu.matmul %67, %69, %cst_33 {dimension_numbers = #tpu.dot_dimension_numbers<[1], [0], [0], [1], [0, 0, 1, 1], [], []>} : vector<8x32xbf16>, vector<32x256xbf16>, vector<8x256xf32> -> vector<8x256xf32>
      %71 = vector.extract_strided_slice %70 {offsets = [0, 0], sizes = [8, 128], strides = [1, 1]} : vector<8x256xf32> to vector<8x128xf32>
      %cst_34 = arith.constant 0.353553385 : f32
      %72 = vector.broadcast %cst_34 : f32 to vector<8x128xf32>
      %73 = arith.mulf %71, %72 : vector<8x128xf32>
      %74 = arith.truncf %73 : vector<8x128xf32> to vector<8x128xbf16>
      %c0_35 = arith.constant 0 : index
      %c0_36 = arith.constant 0 : index
      %75 = vector.load %arg10[%c0_35, %c0_36] : memref<8x128xbf16, #tpu.memory_space<vmem>>, vector<8x128xbf16>
      tpu.vector_store %arg10[%c0_35, %c0_36], %74 {strides = array<i32>} : memref<8x128xbf16, #tpu.memory_space<vmem>>, vector<8x128xbf16>,
      %76 = vector.extract_strided_slice %70 {offsets = [0, 128], sizes = [8, 128], strides = [1, 1]} : vector<8x256xf32> to vector<8x128xf32>
      %77 = arith.truncf %76 : vector<8x128xf32> to vector<8x128xbf16>
      %c0_37 = arith.constant 0 : index
      %c0_38 = arith.constant 0 : index
      %78 = vector.load %arg11[%c0_37, %c0_38] : memref<8x128xbf16, #tpu.memory_space<vmem>>, vector<8x128xbf16>
      tpu.vector_store %arg11[%c0_37, %c0_38], %77 {strides = array<i32>} : memref<8x128xbf16, #tpu.memory_space<vmem>>, vector<8x128xbf16>,
    } else {
    }
    %c8_i32 = arith.constant 8 : i32
    %3 = arith.muli %arg1, %c8_i32 : i32
    %4 = tpu.assume_multiple %3, 8 : i32
    %5 = arith.index_cast %4 : i32 to index
    %c0 = arith.constant 0 : index
    %6 = vector.load %arg9[%5, %c0] : memref<8x32xbf16, #tpu.memory_space<vmem>>, vector<8x32xbf16>
    %c0_1 = arith.constant 0 : index
    %c0_2 = arith.constant 0 : index
    %7 = vector.load %arg5[%c0_1, %c0_2] : memref<32x512xbf16, #tpu.memory_space<vmem>>, vector<32x512xbf16>
    %cst = arith.constant dense<0.000000e+00> : vector<8x512xf32>
    %8 = tpu.matmul %6, %7, %cst {dimension_numbers = #tpu.dot_dimension_numbers<[1], [0], [0], [1], [0, 0, 1, 1], [], []>} : vector<8x32xbf16>, vector<32x512xbf16>, vector<8x512xf32> -> vector<8x512xf32>
    %9 = arith.truncf %8 : vector<8x512xf32> to vector<8x512xbf16>
    %10 = vector.shape_cast %9 : vector<8x512xbf16> to vector<32x128xbf16>
    %c0_3 = arith.constant 0 : index
    %c0_4 = arith.constant 0 : index
    %11 = vector.load %arg10[%c0_3, %c0_4] : memref<8x128xbf16, #tpu.memory_space<vmem>>, vector<8x128xbf16>
    %cst_5 = arith.constant dense<0.000000e+00> : vector<32x8xf32>
    %12 = tpu.matmul %10, %11, %cst_5 {dimension_numbers = #tpu.dot_dimension_numbers<[1], [1], [0], [0], [0, 0, 1, 0], [], []>} : vector<32x128xbf16>, vector<8x128xbf16>, vector<32x8xf32> -> vector<32x8xf32>
    %cst_6 = arith.constant dense<0xFF800000> : vector<32xf32>
    %13 = vector.multi_reduction <maximumf>, %12, %cst_6 [1] : vector<32x8xf32> to vector<32xf32>
    %14 = vector.shape_cast %13 : vector<32xf32> to vector<32x1xf32>
    %15 = vector.broadcast %14 : vector<32x1xf32> to vector<32x8xf32>
    %16 = arith.subf %12, %15 : vector<32x8xf32>
    %17 = math.exp %16 : vector<32x8xf32>
    %cst_7 = arith.constant dense<0.000000e+00> : vector<32xf32>
    %18 = vector.multi_reduction <add>, %17, %cst_7 [1] : vector<32x8xf32> to vector<32xf32>
    %19 = vector.shape_cast %18 : vector<32xf32> to vector<32x1xf32>
    %20 = tpu.reciprocal %19 {approx = true} : vector<32x1xf32> -> vector<32x1xf32>
    %21 = vector.broadcast %20 : vector<32x1xf32> to vector<32x8xf32>
    %22 = arith.mulf %17, %21 : vector<32x8xf32>
    %23 = arith.truncf %22 : vector<32x8xf32> to vector<32x8xbf16>
    %c0_8 = arith.constant 0 : index
    %c0_9 = arith.constant 0 : index
    %24 = vector.load %arg11[%c0_8, %c0_9] : memref<8x128xbf16, #tpu.memory_space<vmem>>, vector<8x128xbf16>
    %cst_10 = arith.constant dense<0.000000e+00> : vector<32x128xf32>
    %25 = tpu.matmul %23, %24, %cst_10 {dimension_numbers = #tpu.dot_dimension_numbers<[1], [0], [0], [1], [0, 0, 1, 1], [], []>} : vector<32x8xbf16>, vector<8x128xbf16>, vector<32x128xf32> -> vector<32x128xf32>
    %26 = arith.truncf %25 : vector<32x128xf32> to vector<32x128xbf16>
    %27 = vector.shape_cast %26 : vector<32x128xbf16> to vector<8x512xbf16>
    %c0_11 = arith.constant 0 : index
    %c0_12 = arith.constant 0 : index
    %28 = vector.load %arg7[%c0_11, %c0_12] : memref<512x128xbf16, #tpu.memory_space<vmem>>, vector<512x128xbf16>
    %cst_13 = arith.constant dense<0.000000e+00> : vector<8x128xf32>
    %29 = tpu.matmul %27, %28, %cst_13 {dimension_numbers = #tpu.dot_dimension_numbers<[1], [0], [0], [1], [0, 0, 1, 1], [], []>} : vector<8x512xbf16>, vector<512x128xbf16>, vector<8x128xf32> -> vector<8x128xf32>
    %30 = arith.truncf %29 : vector<8x128xf32> to vector<8x128xbf16>
    %c0_14 = arith.constant 0 : index
    %c0_15 = arith.constant 0 : index
    %c0_16 = arith.constant 0 : index
    %31 = vector.load %arg8[%c0_14, %c0_15, %c0_16] : memref<1x8x128xbf16, #tpu.memory_space<vmem>>, vector<1x8x128xbf16>
    %32 = vector.shape_cast %31 : vector<1x8x128xbf16> to vector<8x128xbf16>
    %33 = vector.shape_cast %30 : vector<8x128xbf16> to vector<1x8x128xbf16>
    tpu.vector_store %arg8[%c0_14, %c0_15, %c0_16], %33 {strides = array<i32>} : memref<1x8x128xbf16, #tpu.memory_space<vmem>>, vector<1x8x128xbf16>,
    return
  }
  func.func @transform_0(%arg0: i32, %arg1: i32) -> (i32, i32, i32) {
    %c0_i32 = arith.constant 0 : i32
    %c0_i32_0 = arith.constant 0 : i32
    %c0_i32_1 = arith.constant 0 : i32
    return %arg0, %c0_i32, %c0_i32_0 : i32, i32, i32
  }
  func.func @transform_1(%arg0: i32, %arg1: i32) -> (i32, i32) {
    %c0_i32 = arith.constant 0 : i32
    %c0_i32_0 = arith.constant 0 : i32
    %c0_i32_1 = arith.constant 0 : i32
    return %c0_i32, %c0_i32_0 : i32, i32
  }
  func.func @transform_2(%arg0: i32, %arg1: i32) -> (i32, i32) {
    %c0_i32 = arith.constant 0 : i32
    %c0_i32_0 = arith.constant 0 : i32
    %c0_i32_1 = arith.constant 0 : i32
    return %c0_i32, %c0_i32_0 : i32, i32
  }
  func.func @transform_3(%arg0: i32, %arg1: i32) -> (i32, i32) {
    %c0_i32 = arith.constant 0 : i32
    %c0_i32_0 = arith.constant 0 : i32
    %c0_i32_1 = arith.constant 0 : i32
    return %c0_i32, %c0_i32_0 : i32, i32
  }
  func.func @transform_4(%arg0: i32, %arg1: i32) -> (i32, i32) {
    %c0_i32 = arith.constant 0 : i32
    %c0_i32_0 = arith.constant 0 : i32
    %c0_i32_1 = arith.constant 0 : i32
    return %c0_i32, %c0_i32_0 : i32, i32
  }
  func.func @transform_5(%arg0: i32, %arg1: i32) -> (i32, i32) {
    %c0_i32 = arith.constant 0 : i32
    %c0_i32_0 = arith.constant 0 : i32
    %c0_i32_1 = arith.constant 0 : i32
    return %c0_i32, %c0_i32_0 : i32, i32
  }
  func.func @transform_6(%arg0: i32, %arg1: i32) -> (i32, i32, i32) {
    %c0_i32 = arith.constant 0 : i32
    %c0_i32_0 = arith.constant 0 : i32
    return %arg0, %arg1, %c0_i32 : i32, i32, i32
  }
}

module attributes {stable_mosaic.version = 11 : i64} {
  func.func @_attention_kernel(%arg0: i32, %arg1: i32, %arg2: memref<1x8x32xbf16, #tpu.memory_space<vmem>>, %arg3: memref<1x32xbf16, #tpu.memory_space<vmem>>, %arg4: memref<1x32xbf16, #tpu.memory_space<vmem>>, %arg5: memref<32x512xbf16, #tpu.memory_space<vmem>>, %arg6: memref<32x256xbf16, #tpu.memory_space<vmem>>, %arg7: memref<512x128xbf16, #tpu.memory_space<vmem>>, %arg8: memref<1x8x128xbf16, #tpu.memory_space<vmem>>, %arg9: memref<8x32xbf16, #tpu.memory_space<vmem>>, %arg10: memref<8x128xbf16, #tpu.memory_space<vmem>>, %arg11: memref<8x128xbf16, #tpu.memory_space<vmem>>) attributes {dimension_semantics = [#tpu.dimension_semantics<parallel>, #tpu.dimension_semantics<arbitrary>], iteration_bounds = array<i64: 2, 1>, scalar_prefetch = 0 : i64, scratch_operands = 3 : i64, tpu.core_type = #tpu.core_type<tc>, window_params = [{transform_indices = @transform_0, window_bounds = array<i64: 1, 8, 32>}, {pipeline_mode = #tpu.pipeline_mode<synchronous>, transform_indices = @transform_1, window_bounds = array<i64: 1, 32>}, {pipeline_mode = #tpu.pipeline_mode<synchronous>, transform_indices = @transform_2, window_bounds = array<i64: 1, 32>}, {pipeline_mode = #tpu.pipeline_mode<synchronous>, transform_indices = @transform_3, window_bounds = array<i64: 32, 512>}, {pipeline_mode = #tpu.pipeline_mode<synchronous>, transform_indices = @transform_4, window_bounds = array<i64: 32, 256>}, {pipeline_mode = #tpu.pipeline_mode<synchronous>, transform_indices = @transform_5, window_bounds = array<i64: 512, 128>}, {transform_indices = @transform_6, window_bounds = array<i64: 1, 8, 128>}]} {
    %c0_i32 = arith.constant 0 : i32
    %0 = arith.cmpi eq, %arg1, %c0_i32 : i32
    %1 = arith.extui %0 : i1 to i32
    %c0_i32_0 = arith.constant 0 : i32
    %2 = arith.cmpi ne, %1, %c0_i32_0 : i32
    scf.if %2 {
      %c0_17 = arith.constant 0 : index
      %c0_18 = arith.constant 0 : index
      %34 = vector.load %arg3[%c0_17, %c0_18] : memref<1x32xbf16, #tpu.memory_space<vmem>>, vector<1x32xbf16>
      %35 = vector.shape_cast %34 : vector<1x32xbf16> to vector<32xbf16>
      %36 = arith.extf %35 : vector<32xbf16> to vector<32xf32>
      %c0_19 = arith.constant 0 : index
      %c0_20 = arith.constant 0 : index
      %37 = vector.load %arg4[%c0_19, %c0_20] : memref<1x32xbf16, #tpu.memory_space<vmem>>, vector<1x32xbf16>
      %38 = vector.shape_cast %37 : vector<1x32xbf16> to vector<32xbf16>
      %39 = arith.extf %38 : vector<32xbf16> to vector<32xf32>
      %c0_21 = arith.constant 0 : index
      %c0_22 = arith.constant 0 : index
      %c0_23 = arith.constant 0 : index
      %40 = vector.load %arg2[%c0_21, %c0_22, %c0_23] : memref<1x8x32xbf16, #tpu.memory_space<vmem>>, vector<1x8x32xbf16>
      %41 = vector.shape_cast %40 : vector<1x8x32xbf16> to vector<8x32xbf16>
      %42 = arith.extf %41 : vector<8x32xbf16> to vector<8x32xf32>
      %cst_24 = arith.constant dense<0.000000e+00> : vector<8xf32>
      %43 = vector.multi_reduction <add>, %42, %cst_24 [1] : vector<8x32xf32> to vector<8xf32>
      %44 = vector.shape_cast %43 : vector<8xf32> to vector<8x1xf32>
      %cst_25 = arith.constant 3.200000e+01 : f32
      %45 = vector.broadcast %cst_25 : f32 to vector<8x1xf32>
      %46 = arith.divf %44, %45 : vector<8x1xf32>
      %47 = vector.broadcast %46 : vector<8x1xf32> to vector<8x32xf32>
      %48 = arith.subf %42, %47 : vector<8x32xf32>
      %49 = arith.mulf %48, %48 : vector<8x32xf32>
      %cst_26 = arith.constant dense<0.000000e+00> : vector<8xf32>
      %50 = vector.multi_reduction <add>, %49, %cst_26 [1] : vector<8x32xf32> to vector<8xf32>
      %51 = vector.shape_cast %50 : vector<8xf32> to vector<8x1xf32>
      %cst_27 = arith.constant 3.200000e+01 : f32
      %52 = vector.broadcast %cst_27 : f32 to vector<8x1xf32>
      %53 = arith.divf %51, %52 : vector<8x1xf32>
      %54 = vector.broadcast %46 : vector<8x1xf32> to vector<8x32xf32>
      %55 = arith.subf %42, %54 : vector<8x32xf32>
      %cst_28 = arith.constant 9.99999974E-6 : f32
      %56 = vector.broadcast %cst_28 : f32 to vector<8x1xf32>
      %57 = arith.addf %53, %56 : vector<8x1xf32>
      %58 = math.rsqrt %57 : vector<8x1xf32>
      %59 = vector.broadcast %58 : vector<8x1xf32> to vector<8x32xf32>
      %60 = arith.mulf %55, %59 : vector<8x32xf32>
      %61 = vector.shape_cast %36 : vector<32xf32> to vector<1x32xf32>
      %62 = vector.broadcast %61 : vector<1x32xf32> to vector<8x32xf32>
      %63 = arith.mulf %60, %62 : vector<8x32xf32>
      %64 = vector.shape_cast %39 : vector<32xf32> to vector<1x32xf32>
      %65 = vector.broadcast %64 : vector<1x32xf32> to vector<8x32xf32>
      %66 = arith.addf %63, %65 : vector<8x32xf32>
      %67 = arith.truncf %66 : vector<8x32xf32> to vector<8x32xbf16>
      %c0_29 = arith.constant 0 : index
      %c0_30 = arith.constant 0 : index
      %68 = vector.load %arg9[%c0_29, %c0_30] : memref<8x32xbf16, #tpu.memory_space<vmem>>, vector<8x32xbf16>
      tpu.vector_store %arg9[%c0_29, %c0_30], %67 {strides = array<i32>} : memref<8x32xbf16, #tpu.memory_space<vmem>>, vector<8x32xbf16>,
      %c0_31 = arith.constant 0 : index
      %c0_32 = arith.constant 0 : index
      %69 = vector.load %arg6[%c0_31, %c0_32] : memref<32x256xbf16, #tpu.memory_space<vmem>>, vector<32x256xbf16>
      %cst_33 = arith.constant dense<0.000000e+00> : vector<8x256xf32>
      %70 = tpu.matmul %67, %69, %cst_33 {dimension_numbers = #tpu.dot_dimension_numbers<[1], [0], [0], [1], [0, 0, 1, 1], [], []>} : vector<8x32xbf16>, vector<32x256xbf16>, vector<8x256xf32> -> vector<8x256xf32>
      %71 = vector.extract_strided_slice %70 {offsets = [0, 0], sizes = [8, 128], strides = [1, 1]} : vector<8x256xf32> to vector<8x128xf32>
      %cst_34 = arith.constant 0.353553385 : f32
      %72 = vector.broadcast %cst_34 : f32 to vector<8x128xf32>
      %73 = arith.mulf %71, %72 : vector<8x128xf32>
      %74 = arith.truncf %73 : vector<8x128xf32> to vector<8x128xbf16>
      %c0_35 = arith.constant 0 : index
      %c0_36 = arith.constant 0 : index
      %75 = vector.load %arg10[%c0_35, %c0_36] : memref<8x128xbf16, #tpu.memory_space<vmem>>, vector<8x128xbf16>
      tpu.vector_store %arg10[%c0_35, %c0_36], %74 {strides = array<i32>} : memref<8x128xbf16, #tpu.memory_space<vmem>>, vector<8x128xbf16>,
      %76 = vector.extract_strided_slice %70 {offsets = [0, 128], sizes = [8, 128], strides = [1, 1]} : vector<8x256xf32> to vector<8x128xf32>
      %77 = arith.truncf %76 : vector<8x128xf32> to vector<8x128xbf16>
      %c0_37 = arith.constant 0 : index
      %c0_38 = arith.constant 0 : index
      %78 = vector.load %arg11[%c0_37, %c0_38] : memref<8x128xbf16, #tpu.memory_space<vmem>>, vector<8x128xbf16>
      tpu.vector_store %arg11[%c0_37, %c0_38], %77 {strides = array<i32>} : memref<8x128xbf16, #tpu.memory_space<vmem>>, vector<8x128xbf16>,
    } else {
    }
    %c8_i32 = arith.constant 8 : i32
    %3 = arith.muli %arg1, %c8_i32 : i32
    %4 = tpu.assume_multiple %3, 8 : i32
    %5 = arith.index_cast %4 : i32 to index
    %c0 = arith.constant 0 : index
    %6 = vector.load %arg9[%5, %c0] : memref<8x32xbf16, #tpu.memory_space<vmem>>, vector<8x32xbf16>
    %c0_1 = arith.constant 0 : index
    %c0_2 = arith.constant 0 : index
    %7 = vector.load %arg5[%c0_1, %c0_2] : memref<32x512xbf16, #tpu.memory_space<vmem>>, vector<32x512xbf16>
    %cst = arith.constant dense<0.000000e+00> : vector<8x512xf32>
    %8 = tpu.matmul %6, %7, %cst {dimension_numbers = #tpu.dot_dimension_numbers<[1], [0], [0], [1], [0, 0, 1, 1], [], []>} : vector<8x32xbf16>, vector<32x512xbf16>, vector<8x512xf32> -> vector<8x512xf32>
    %9 = arith.truncf %8 : vector<8x512xf32> to vector<8x512xbf16>
    %10 = vector.shape_cast %9 : vector<8x512xbf16> to vector<32x128xbf16>
    %c0_3 = arith.constant 0 : index
    %c0_4 = arith.constant 0 : index
    %11 = vector.load %arg10[%c0_3, %c0_4] : memref<8x128xbf16, #tpu.memory_space<vmem>>, vector<8x128xbf16>
    %cst_5 = arith.constant dense<0.000000e+00> : vector<32x8xf32>
    %12 = tpu.matmul %10, %11, %cst_5 {dimension_numbers = #tpu.dot_dimension_numbers<[1], [1], [0], [0], [0, 0, 1, 0], [], []>} : vector<32x128xbf16>, vector<8x128xbf16>, vector<32x8xf32> -> vector<32x8xf32>
    %cst_6 = arith.constant dense<0xFF800000> : vector<32xf32>
    %13 = vector.multi_reduction <maximumf>, %12, %cst_6 [1] : vector<32x8xf32> to vector<32xf32>
    %14 = vector.shape_cast %13 : vector<32xf32> to vector<32x1xf32>
    %15 = vector.broadcast %14 : vector<32x1xf32> to vector<32x8xf32>
    %16 = arith.subf %12, %15 : vector<32x8xf32>
    %17 = math.exp %16 : vector<32x8xf32>
    %cst_7 = arith.constant dense<0.000000e+00> : vector<32xf32>
    %18 = vector.multi_reduction <add>, %17, %cst_7 [1] : vector<32x8xf32> to vector<32xf32>
    %19 = vector.shape_cast %18 : vector<32xf32> to vector<32x1xf32>
    %20 = tpu.reciprocal %19 {approx = true} : vector<32x1xf32> -> vector<32x1xf32>
    %21 = vector.broadcast %20 : vector<32x1xf32> to vector<32x8xf32>
    %22 = arith.mulf %17, %21 : vector<32x8xf32>
    %23 = arith.truncf %22 : vector<32x8xf32> to vector<32x8xbf16>
    %c0_8 = arith.constant 0 : index
    %c0_9 = arith.constant 0 : index
    %24 = vector.load %arg11[%c0_8, %c0_9] : memref<8x128xbf16, #tpu.memory_space<vmem>>, vector<8x128xbf16>
    %cst_10 = arith.constant dense<0.000000e+00> : vector<32x128xf32>
    %25 = tpu.matmul %23, %24, %cst_10 {dimension_numbers = #tpu.dot_dimension_numbers<[1], [0], [0], [1], [0, 0, 1, 1], [], []>} : vector<32x8xbf16>, vector<8x128xbf16>, vector<32x128xf32> -> vector<32x128xf32>
    %26 = arith.truncf %25 : vector<32x128xf32> to vector<32x128xbf16>
    %27 = vector.shape_cast %26 : vector<32x128xbf16> to vector<8x512xbf16>
    %c0_11 = arith.constant 0 : index
    %c0_12 = arith.constant 0 : index
    %28 = vector.load %arg7[%c0_11, %c0_12] : memref<512x128xbf16, #tpu.memory_space<vmem>>, vector<512x128xbf16>
    %cst_13 = arith.constant dense<0.000000e+00> : vector<8x128xf32>
    %29 = tpu.matmul %27, %28, %cst_13 {dimension_numbers = #tpu.dot_dimension_numbers<[1], [0], [0], [1], [0, 0, 1, 1], [], []>} : vector<8x512xbf16>, vector<512x128xbf16>, vector<8x128xf32> -> vector<8x128xf32>
    %30 = arith.truncf %29 : vector<8x128xf32> to vector<8x128xbf16>
    %c0_14 = arith.constant 0 : index
    %c0_15 = arith.constant 0 : index
    %c0_16 = arith.constant 0 : index
    %31 = vector.load %arg8[%c0_14, %c0_15, %c0_16] : memref<1x8x128xbf16, #tpu.memory_space<vmem>>, vector<1x8x128xbf16>
    %32 = vector.shape_cast %31 : vector<1x8x128xbf16> to vector<8x128xbf16>
    %33 = vector.shape_cast %30 : vector<8x128xbf16> to vector<1x8x128xbf16>
    tpu.vector_store %arg8[%c0_14, %c0_15, %c0_16], %33 {strides = array<i32>} : memref<1x8x128xbf16, #tpu.memory_space<vmem>>, vector<1x8x128xbf16>,
    return
  }
  func.func @transform_0(%arg0: i32, %arg1: i32) -> (i32, i32, i32) {
    %c0_i32 = arith.constant 0 : i32
    %c0_i32_0 = arith.constant 0 : i32
    %c0_i32_1 = arith.constant 0 : i32
    return %arg0, %c0_i32, %c0_i32_0 : i32, i32, i32
  }
  func.func @transform_1(%arg0: i32, %arg1: i32) -> (i32, i32) {
    %c0_i32 = arith.constant 0 : i32
    %c0_i32_0 = arith.constant 0 : i32
    %c0_i32_1 = arith.constant 0 : i32
    return %c0_i32, %c0_i32_0 : i32, i32
  }
  func.func @transform_2(%arg0: i32, %arg1: i32) -> (i32, i32) {
    %c0_i32 = arith.constant 0 : i32
    %c0_i32_0 = arith.constant 0 : i32
    %c0_i32_1 = arith.constant 0 : i32
    return %c0_i32, %c0_i32_0 : i32, i32
  }
  func.func @transform_3(%arg0: i32, %arg1: i32) -> (i32, i32) {
    %c0_i32 = arith.constant 0 : i32
    %c0_i32_0 = arith.constant 0 : i32
    %c0_i32_1 = arith.constant 0 : i32
    return %c0_i32, %c0_i32_0 : i32, i32
  }
  func.func @transform_4(%arg0: i32, %arg1: i32) -> (i32, i32) {
    %c0_i32 = arith.constant 0 : i32
    %c0_i32_0 = arith.constant 0 : i32
    %c0_i32_1 = arith.constant 0 : i32
    return %c0_i32, %c0_i32_0 : i32, i32
  }
  func.func @transform_5(%arg0: i32, %arg1: i32) -> (i32, i32) {
    %c0_i32 = arith.constant 0 : i32
    %c0_i32_0 = arith.constant 0 : i32
    %c0_i32_1 = arith.constant 0 : i32
    return %c0_i32, %c0_i32_0 : i32, i32
  }
  func.func @transform_6(%arg0: i32, %arg1: i32) -> (i32, i32, i32) {
    %c0_i32 = arith.constant 0 : i32
    %c0_i32_0 = arith.constant 0 : i32
    return %arg0, %arg1, %c0_i32 : i32, i32, i32
  }
}

</mosaic_0001>

<bundles_post_ra>
// kernel: tpu_custom_call.1
= control target key start
LH: loop header
LB: loop body
LE: loop exit
PB: predicated region body
PF: predicated region fallthrough
CT: control target
= control target key end

     0   :  { %11 = vsyncpa [#allocation6], 0  ;;  %s2053_s0 = inlined_call_operand.hbm [shape: bf16[2,8,32], index: 0, kind: input, shape index: {}]   ;;  %s2054_s1 = inlined_call_operand.hbm [shape: bf16[1,32], index: 1, kind: input, shape index: {}]   ;;  %s2055_s2 = inlined_call_operand.vmem [shape: bf16[1,32], index: 2, kind: input, shape index: {}]   ;;  %s2056_s3 = inlined_call_operand.hbm [shape: bf16[32,512], index: 3, kind: input, shape index: {}]   ;;  %s2057_s4 = inlined_call_operand.hbm [shape: bf16[32,256], index: 4, kind: input, shape index: {}]   ;;  %s2058_s5 = inlined_call_operand.hbm [shape: bf16[512,128], index: 5, kind: input, shape index: {}]   ;;  %s2059_s6 = inlined_call_operand.hbm [shape: bf16[2,8,128], index: 6, kind: output, shape index: {}]  }
   0x1   :  { %13 = vsyncpa [#allocation6 + $0x1], 0 }
   0x2   :  { %14 = vsyncpa [#allocation9], 0 }
   0x3   :  { %15 = vsyncpa [#allocation12], 0 }
   0x4   :  { %16 = vsyncpa [#allocation7], 0 }
   0x5   :  { %18 = vsyncpa [#allocation7 + $0x1], 0  ;;  %s1855_s21 = smov 0   ;;  %s1857_s22 = smov 0  }
   0x6   :  { %s1859_s23 = smov 0   ;;  %s1861_s24 = smov 0  }
   0x7   :  { %s1863_s25 = smov 0   ;;  %s1865_s26 = smov 0  }
   0x8 LB: > { %s1184_s27 = sadd.s32 4294967295, %s1807_s26   ;;  %p1186_p0 = scmp.ge.s32.totalorder %s1807_s26, 1  ;;  %s1807_s26 = sphi %s1865_s26, %s24_s26   ;;  %s1803_s25 = sphi %s1863_s25, %s2070_s25   ;;  %s1799_s24 = sphi %s1861_s24, %s2069_s24   ;;  %s1795_s23 = sphi %s1859_s23, %s2068_s23   ;;  %s1791_s22 = sphi %s1857_s22, %s2067_s22   ;;  %s1787_s21 = sphi %s1855_s21, %s2066_s21  }
   0x9   : > { %p1889_p1 = scmp.eq.s32.totalorder %s1184_s27, 0  ;;  %p200_p2 = scmp.lt.s32.totalorder %s1807_s26, 3 }
   0xa   : > { %s212_s7 = sshll.u32 %s2054_s1, 4  ;;  %p1191_p4 = scmp.ge.s32.totalorder %s1807_s26, 2  ;;  %s213_s7 = int_to_ptr.hbm [resolvable:$true] %s212_s7 }
   0xb   : > { %p1897_p3 = pnand %p1186_p0, %p200_p2  ;;  %s1809_s9 = smov [#allocation8]  }
   0xc   : > { %s214_s10 = sshll.u32 %s1809_s9, 4  ;;  %s240_s13 = sshll.u32 %s2057_s4, 4  ;;  %s215_s10 = int_to_ptr.vmem [resolvable:$true] %s214_s10  ;;  %s241_s13 = int_to_ptr.hbm [resolvable:$true] %s240_s13 }
   0xd   : > { %p1457_p5 = pneg %p1897_p3  ;;  %s1810_s15 = smov [#allocation11]  }
   0xe   : > { %s242_s16 = sshll.u32 %s1810_s15, 4  ;;  %s1811_s17 = smov 128   ;;  %s243_s16 = int_to_ptr.vmem [resolvable:$true] %s242_s16 }
   0xf   : > { %p1909_p6 = pnand %p1457_p5, %p1889_p1  ;;  %s1812_s18 = smov 8  }
  0x10   : > { %s226_s29 = sshll.u32 %s2056_s3, 4  ;;  %s1813_s30 = smov [#allocation10]   ;;  %s227_s29 = int_to_ptr.hbm [resolvable:$true] %s226_s29 }
  0x11   : > { %1460 = dma.hbm_to_vmem [thread:$0]  (!%p1909_p6), %s213_s7, 16, %s215_s10, [#allocation9]  }
  0x12   : > { %1466 = dma.hbm_to_vmem [thread:$0]  (!%p1909_p6), %s241_s13, 512, %s243_s16, [#allocation12], %s1811_s17, %s1811_s17, %s1812_s18  }
  0x13   : > { %s228_s9 = sshll.u32 %s1813_s30, 4  ;;  %s254_s7 = sshll.u32 %s2058_s5, 4  ;;  %s229_s9 = int_to_ptr.vmem [resolvable:$true] %s228_s9  ;;  %s255_s7 = int_to_ptr.hbm [resolvable:$true] %s254_s7 }
  0x14   : > { %s1814_s10 = smov 256   ;;  %s1815_s13 = smov 16  }
  0x15   : > { %1463 = dma.hbm_to_vmem [thread:$0]  (!%p1909_p6), %s227_s29, 1024, %s229_s9, [#allocation9], %s1814_s10, %s1814_s10, %s1815_s13  }
  0x16   : > { %s1816_s15 = smov [#allocation13]   ;;  %s1817_s17 = smov 64  }
  0x17   : > { %s256_s16 = sshll.u32 %s1816_s15, 4  ;;  %s1818_s18 = smov 4   ;;  %s257_s16 = int_to_ptr.vmem [resolvable:$true] %s256_s16 }
  0x18   : > { %1469 = dma.hbm_to_vmem [thread:$0]  (!%p1909_p6), %s255_s7, 4096, %s257_s16, [#allocation12], %s1817_s17, %s1817_s17, %s1818_s18  }
  0x19   : > { %s36_s19 = sadd.s32 1, %s1803_s25  ;;  %s1185_s20 = sadd.s32 4294967294, %s1807_s26  }
  0x1a   : > { %p38_p7 = scmp.ge.s32.totalorder %s36_s19, 2  ;;  %s43_s30 = sadd.s32 1, %s1795_s23 }
  0x1b   : > { %p50_p8 = scmp.ne.s32.totalorder %s1795_s23, %s1791_s22  ;;  %p51_p9 = scmp.eq.s32.totalorder %s1807_s26, 0 }
  0x1c   : > { %s2072_s19 = smov (%p38_p7, %s36_s19), 0  ;;  %p56_p10 = scmp.ne.s32.totalorder %s1791_s22, %s1787_s21 }
  0x1d   : > { %s40_s29 = ssub.s32 %s1803_s25, %s2072_s19  ;;  %p187_p11 = scmp.eq.s32.totalorder %s1184_s27, 1 }
  0x1e   : > { %p41_p12 = scmp.eq.s32.totalorder %s40_s29, 0  ;;  %p1943_p13 = por %p1889_p1, %p56_p10 }
  0x1f   : > { %p1947_p0 = por %p187_p11, %p50_p8  ;;  %p193_p2 = scmp.eq.s32.totalorder %s1185_s20, 1 }
  0x20   : > { %s1952_s11 = scalar_select %p41_p12, %s1795_s23, %s43_s30  }
  0x21   : > { %p52_p5 = por %p51_p9, %p50_p8  ;;  %p1954_p6 = por %p193_p2, %p56_p10 }
  0x22   : > { %s270_s7 = sand.u32 1, %s1795_s23   ;;  %s1193_s27 = sshll.u32 %s1803_s25, 2 }
  0x23   : > { %p1482_p7 = scmp.lt.s32.totalorder %s1807_s26, 2  ;;  %s1192_s10 = sshll.u32 %s270_s7, 2 }
  0x24   : > { %s278_s16 = scalar_lea.hbm %s2053_s0, %s1193_s27  ;;  %s274_s18 = scalar_lea.vmem [#allocation5], %s1192_s10 }
  0x25   : > { %s280_s17 = sshll.u32 %s278_s16, 4  ;;  %s282_s29 = sshll.u32 %s274_s18, 4  ;;  %s281_s17 = int_to_ptr.hbm [resolvable:$true] %s280_s17  ;;  %s283_s29 = int_to_ptr.vmem [resolvable:$true] %s282_s29 }
  0x26   : > { %p1471_p11 = pnand %p1482_p7, %p52_p5  ;;  %s271_s20 = scalar_lea.sflag [#allocation6], %s270_s7 }
  0x27   : > { %291 = sbr.rel (%p1897_p3) target bundleno = 1195 (0x4ab), region = 44  ;;  %s1967_s30 = sand.u32 (!%p1897_p3), 1, %s1791_s22  }
  0x28   : > { %1473 = dma.hbm_to_vmem [thread:$0]  (!%p1471_p11), %s281_s17, 64, %s283_s29, %s271_s20  }
  0x29   : > { %s1195_s13 = sshll.u32 (!%p1897_p3), %s1967_s30, 2  ;;  %s294_s27 = scalar_lea.sflag (!%p1897_p3), [#allocation6], %s1967_s30 }
  0x2a   : > { %s297_s10 = scalar_lea.vmem (!%p1897_p3), [#allocation5], %s1195_s13 }
  0x2c   : > { %1770 = dma.done.wait (%p1943_p13), %s294_s27, 64  }
  0x2d   : > { %1772 = vsyncadd (%p1943_p13), %s294_s27, 4294967232 }
  0x2e   : > { %1774 = dma.done.wait (%p1889_p1), [#allocation9], 1040  }
  0x2f   : > { %1776 = vsyncadd (%p1889_p1), [#allocation9], 4294966256 }
  0x30   : > { %1778 = dma.done.wait (%p1889_p1), [#allocation12], 4608  }
  0x31   : > { %1780 = vsyncadd (%p1889_p1), [#allocation12], 4294962688  ;;  %v356_v0 = vld [vmem:[%s297_s10] sm:$0xf]  ;;  %vm358_vm0 = vcmask 261120   ;;  %v1819_v3 = vmov 32.0  }
  0x32   : > { %v357_v1 = vunpack.c.l.bf16 %v356_v0  ;;  %1547 = vrcp.f32 %v1819_v3  ;;  %v1211_v15 = vld [vmem:[#allocation11 + $0x10] sm:$0xf]  ;;  %v1396_v16 = vld [vmem:[#allocation11 + $0x14] sm:$0xf0]  ;;  %v1395_v17 = vld [vmem:[#allocation11 + $0x14] sm:$0xf] }
  0x33   : > { %v1212_v18 = vor.u32 %v1396_v16, %v1211_v15  ;;  %v1213_v19 = vld [vmem:[#allocation11 + $0x18] sm:$0xf0]  ;;  %v1203_v20 = vld [vmem:[#allocation11] sm:$0xf]  ;;  %v1394_v21 = vld [vmem:[#allocation11 + $0x4] sm:$0xf0] }
  0x34   : > { %v359_v2 = vsel %vm358_vm0, %v357_v1, 0.0  ;;  %v1216_v22 = vor.u32 %v1395_v17, %v1213_v19  ;;  %v1393_v23 = vld [vmem:[#allocation11 + $0x4] sm:$0xf]  ;;  %v1205_v24 = vld [vmem:[#allocation11 + $0x8] sm:$0xf0]  ;;  %v1204_v25 = vor.u32 %v1394_v21, %v1203_v20  ;;  %vm393_vm5 = vcmask 257024  }
  0x35   : > { %360 = vadd.xlane.f32.xlu0 %v359_v2  ;;  %428 = vmatpush.bf16.msra.mxu0 %v1212_v18  ;;  %v1208_v26 = vor.u32 %v1393_v23, %v1205_v24  ;;  %v1237_v27 = vld [vmem:[#allocation10 + $0x20] sm:$0xf]  ;;  %v1403_v28 = vld [vmem:[#allocation10 + $0x2c] sm:$0xf0]  ;;  %v1401_v30 = vld [vmem:[#allocation10 + $0x24] sm:$0xf] }
  0x36   : > { %441 = vmatpush.bf16.msra.mxu1 %v1216_v22  ;;  %v1238_v29 = vor.u32 %v1403_v28, %v1237_v27  ;;  %v1239_v31 = vld [vmem:[#allocation10 + $0x30] sm:$0xf0]  ;;  %v1245_v32 = vld [vmem:[#allocation10 + $0x28] sm:$0xf]  ;;  %v1404_v33 = vld [vmem:[#allocation10 + $0x34] sm:$0xf0] }
  0x37   : > { %v1402_v34 = vld [vmem:[#allocation10 + $0x2c] sm:$0xf]  ;;  %v1242_v35 = vor.u32 %v1401_v30, %v1239_v31  ;;  %v1246_v37 = vor.u32 %v1404_v33, %v1245_v32  ;;  %v1247_v38 = vld [vmem:[#allocation10 + $0x38] sm:$0xf0]  ;;  %v1221_v39 = vld [vmem:[#allocation10] sm:$0xf] }
  0x38   : > { %v1548_v4 = vpop.eup %1547  ;;  %517 = vmatpush.bf16.msra.mxu2 %v1238_v29  ;;  %v1399_v40 = vld [vmem:[#allocation10 + $0xc] sm:$0xf0]  ;;  %v1250_v42 = vor.u32 %v1402_v34, %v1247_v38  ;;  %v1397_v44 = vld [vmem:[#allocation10 + $0x4] sm:$0xf]  ;;  %v1223_v45 = vld [vmem:[#allocation10 + $0x10] sm:$0xf0] }
  0x39   : > { %v363_v5 = vmul.f32 32.0, %v1548_v4  ;;  %vm367_vm1 = vweird.f32 %v1548_v4  ;;  %429 = vmatpush.bf16.msra.mxu0 %v1204_v25  ;;  %530 = vmatpush.bf16.msra.mxu3 %v1242_v35  ;;  %v1222_v43 = vor.u32 %v1399_v40, %v1221_v39  ;;  %v1226_v46 = vor.u32 %v1397_v44, %v1223_v45  ;;  %v1229_v48 = vld [vmem:[#allocation10 + $0x8] sm:$0xf]  ;;  %v1400_v49 = vld [vmem:[#allocation10 + $0x14] sm:$0xf0]  ;;  %s1390_s14 = sshll.u32 %s1799_s24, 2 }
  0x3a   : > { %442 = vmatpush.bf16.msra.mxu1 %v1208_v26  ;;  %v1398_v50 = vld [vmem:[#allocation10 + $0xc] sm:$0xf]  ;;  %v1230_v51 = vor.u32 %v1400_v49, %v1229_v48  ;;  %v1231_v52 = vld [vmem:[#allocation10 + $0x18] sm:$0xf0]  ;;  %v354_v59 = vld [vmem:[%s2055_s2] sm:$0x1]  ;;  %s1060_s16 = scalar_lea.hbm %s2059_s6, %s1390_s14 }
  0x3b   : > { %v364_v6 = vsub.f32 1.0, %v363_v5  ;;  %v1234_v53 = vor.u32 %v1398_v50, %v1231_v52  ;;  %v352_v57 = vld [vmem:[#allocation8] sm:$0x1]  ;;  %v355_v62 = vunpack.c.l.bf16 %v354_v59  ;;  %vm578_vm6 = vcmask 1043456   ;;  %s346_s17 = scalar_lea.vmem [#allocation14], %s1195_s13  ;;  %s1064_s29 = sshll.u32 %s1060_s16, 4  ;;  %s1065_s29 = int_to_ptr.hbm [resolvable:$true] %s1064_s29 }
  0x3c   : > { %518 = vmatpush.bf16.msra.mxu2 %v1222_v43  ;;  %v353_v60 = vunpack.c.l.bf16 %v352_v57  ;;  %vm570_vm7 = vcmask 1041408   ;;  %vm574_vm8 = vcmask 1045508   ;;  %vm583_vm9 = vcmask 1045504   ;;  %s1062_s18 = sshll.u32 %s346_s17, 4  ;;  %s1049_s24 = scalar_lea.sflag [#allocation7], %s1967_s30  ;;  %s1063_s18 = int_to_ptr.vmem [resolvable:$true] %s1062_s18 }
  0x3d   : > { %v365_v7 = vmul.f32 %v1548_v4, %v364_v6  ;;  %543 = vmatpush.bf16.msrb.mxu0 %v1246_v37  ;;  %531 = vmatpush.bf16.msra.mxu3 %v1226_v46  ;;  %v390_v3 = vperm.slane %v355_v62, 0  ;;  %vm581_vm10 = vcmask 1043458   ;;  %vm585_vm11 = vcmask 1045506   ;;  %s1731_s20 = sshra.s32 %s1065_s29, 4  ;;  %s1737_s13 = scalar_lea.hbm %s2059_s6, 8  ;;  %s1732_s20 = int_to_ptr.hbm [resolvable:$true] %s1731_s20 }
  0x3e   : > { %556 = vmatpush.bf16.msrb.mxu1 %v1250_v42  ;;  %v388_v0 = vperm.slane %v353_v60, 0  ;;  %vm623_vm12 = vcmask 64512   ;;  %s1733_s27 = scalar_lea.hbm %s1732_s20, 4  ;;  %p1738_p9 = scmp.lt.s32.totalorder %s1732_s20, %s2059_s6 }
  0x3f   : > { %v366_v8 = vadd.f32 %v1548_v4, %v365_v7  ;;  %p1734_p1 = scmp.ne.s32.totalorder %s1732_s20, %s1733_s27  ;;  %p1739_p10 = scmp.lt.s32.totalorder %s1737_s13, %s1733_s27 }
  0x41   : > { %v368_v9 = vsel %vm367_vm1, %v1548_v4, %v366_v8  ;;  %544 = vmatpush.bf16.msrb.mxu0 %v1230_v51  ;;  %p1735_p3 = pnand %p1734_p1, %p1947_p0  ;;  %p1740_p12 = por %p1739_p10, %p1738_p9 }
  0x42   : > { %557 = vmatpush.bf16.msrb.mxu1 %v1234_v53 }
  0x43   : > { %p1736_p8 = pneg %p1735_p3 }
  0x45   : > { %p1741_p13 = pnand %p1740_p12, %p1736_p8 }
  0xa8   : > { %v361_v10 = vpop.xlane.xlu0 %360 }
  0xa9   : > { %v369_v11 = vmul.f32 %v368_v9, %v361_v10 }
  0xab   : > { %v1986_v12 = vsub.f32 %v357_v1, %v369_v11 }
  0xad   : > { %v371_v13 = vmul.f32 %v1986_v12, %v1986_v12 }
  0xaf   : > { %v372_v14 = vsel %vm358_vm0, %v371_v13, 0.0 }
  0xb0   : > { %373 = vadd.xlane.f32.xlu0 %v372_v14 }
 0x123   : > { %v374_v36 = vpop.xlane.xlu0 %373 }
 0x124   : > { %v375_v41 = vmul.f32 %v374_v36, %v368_v9 }
 0x126   : > { %v376_v47 = vadd.f32 1e-05, %v375_v41 }
 0x128   : > { %1549 = vrsqrt.f32 %v376_v47  ;;  %vm383_vm3 = vweird.f32 %v376_v47 }
 0x12e   : > { %v1550_v54 = vpop.eup %1549 }
 0x12f   : > { %v378_v55 = vmul.f32 %v1550_v54, %v376_v47  ;;  %vm384_vm2 = vweird.f32 %v1550_v54 }
 0x130   : > { %vm385_vm4 = vmor %vm383_vm3, %vm384_vm2 }
 0x131   : > { %v379_v56 = vmul.f32 %v1550_v54, %v378_v55 }
 0x133   : > { %v380_v58 = vmul.f32 0.5, %v379_v56 }
 0x135   : > { %v381_v61 = vsub.f32 1.5, %v380_v58 }
 0x137   : > { %v382_v63 = vmul.f32 %v1550_v54, %v381_v61 }
 0x139   : > { %v386_v1 = vsel %vm385_vm4, %v1550_v54, %v382_v63 }
 0x13a   : > { %v387_v2 = vmul.f32 %v386_v1, %v1986_v12 }
 0x13c   : > { %v389_v4 = vmul.f32 %v388_v0, %v387_v2 }
 0x13e   : > { %v391_v5 = vadd.f32 %v390_v3, %v389_v4 }
 0x140   : > { %v392_v6 = vpack.c.bf16 %v391_v5, %v391_v5 }
 0x142   : > { %394 = vst.msk [vmem:[#allocation2] sm:$0xf] %vm393_vm5, %v392_v6  ;;  %1217 = vmatmul.msk.bf16.vlgmr.msra.gmra.mxu0 %vm358_vm0, %v392_v6  ;;  %1218 = vmatmul.msk.bf16.vlgmr.msra.gmra.mxu1 %vm358_vm0, %v392_v6 }
 0x149   : > { %v458_v7 = vld [vmem:[#allocation2] sm:$0xf] }
 0x14a   : > { %1251 = vmatmul.msk.bf16.vlgmr.msra.gmra.mxu2 %vm358_vm0, %v458_v7  ;;  %1252 = vmatmul.msk.bf16.vlgmr.msra.gmra.mxu3 %vm358_vm0, %v458_v7 }
 0x152   : > { %1253 = vmatmul.msk.bf16.vlgmr.msrb.gmra.mxu0 %vm358_vm0, %v458_v7  ;;  %1254 = vmatmul.msk.bf16.vlgmr.msrb.gmra.mxu1 %vm358_vm0, %v458_v7 }
 0x1bf   : > { %v431_v8 = vpop.f32.mrf.mxu0  ;;  %v444_v9 = vpop.f32.mrf.mxu1 }
 0x1c0   : > { %v448_v10 = vmul.f32 0.35355338, %v431_v8  ;;  %v451_v11 = vpack.c.bf16 %v444_v9, %v444_v9 }
 0x1c2   : > { %v449_v12 = vpack.c.bf16 %v448_v10, %v448_v10  ;;  %452 = vst [vmem:[#allocation4] sm:$0xf] %v451_v11 }
 0x1c4   : > { %450 = vst [vmem:[#allocation3] sm:$0xf] %v449_v12 }
 0x1c7   : > { %v433_v13 = vpop.f32.mrf.mxu0  ;;  %v446_v14 = vpop.f32.mrf.mxu1 }
 0x1c9   : > { %v670_v15 = vld [vmem:[#allocation4] sm:$0xf] }
 0x1ca   : > { %v678_v16 = vsel %vm578_vm6, %v670_v15, 0 }
 0x1cb   : > { %687 = vmatpush.bf16.msrb.mxu3 %v678_v16  ;;  %v603_v17 = vld [vmem:[#allocation3] sm:$0xf] }
 0x1cc   : > { %611 = vmatpush.bf16.xpose.msrb.mxu2 %v603_v17 }
 0x1cd   : > { %v520_v18 = vpop.f32.mrf.mxu2  ;;  %v533_v19 = vpop.f32.mrf.mxu3 }
 0x1ce   : > { %v563_v20 = vpack.c.bf16 %v533_v19, %v520_v18 }
 0x1cf   : > { %v546_v21 = vpop.f32.mrf.mxu0  ;;  %v559_v22 = vpop.f32.mrf.mxu1 }
 0x1d0   : > { %v567_v23 = vrot.slane %v563_v20, 2  ;;  %v564_v24 = vpack.c.bf16 %v559_v22, %v546_v21 }
 0x1d2   : > { %v568_v25 = vrot.slane %v564_v24, 4  ;;  %v569_v26 = vrot.slane %v564_v24, 6  ;;  %v573_v27 = vsel %vm570_vm7, %v563_v20, %v567_v23  ;;  %v582_v37 = vsel %vm581_vm10, %v563_v20, %v567_v23 }
 0x1d4   : > { %v577_v28 = vsel %vm574_vm8, %v568_v25, %v569_v26  ;;  %v584_v32 = vsel %vm583_vm9, %v569_v26, %v568_v25 }
 0x1d5   : > { %v579_v29 = vsel %vm578_vm6, %v573_v27, %v577_v28  ;;  %v522_v30 = vpop.f32.mrf.mxu2  ;;  %v535_v31 = vpop.f32.mrf.mxu3  ;;  %v586_v39 = vsel %vm585_vm11, %v582_v37, %v584_v32  ;;  %v1428_v28 = vld [vmem:[#allocation13 + $0xb8] sm:$0xff]  ;;  %v1427_v32 = vld [vmem:[#allocation13 + $0xb0] sm:$0xff]  ;;  %v1434_v37 = vld [vmem:[#allocation13 + $0xe8] sm:$0xff] }
 0x1d6   : > { %v589_v33 = vunpack.c.l.b16 %v579_v29  ;;  %v590_v34 = vunpack.c.h.b16 %v579_v29  ;;  %v588_v43 = vrot.slane %v586_v39, 2  ;;  %v1436_v29 = vld [vmem:[#allocation13 + $0xf8] sm:$0xff]  ;;  %1020 = vmatpush.bf16.msra.mxu2 %v1428_v28  ;;  %v1418_v39 = vld [vmem:[#allocation13 + $0x68] sm:$0xff] }
 0x1d7   : > { %v548_v35 = vpop.f32.mrf.mxu0  ;;  %v561_v36 = vpop.f32.mrf.mxu1  ;;  %v1412_v30 = vld [vmem:[#allocation13 + $0x38] sm:$0xff]  ;;  %1033 = vmatpush.bf16.msra.mxu3 %v1436_v29 }
 0x1d8   : > { %v591_v38 = vpack.i.b16 %v590_v34, %v589_v33  ;;  %v596_v44 = vunpack.c.l.b16 %v588_v43  ;;  %v597_v45 = vunpack.c.h.b16 %v588_v43  ;;  %v1420_v31 = vld [vmem:[#allocation13 + $0x78] sm:$0xff]  ;;  %994 = vmatpush.bf16.msra.mxu0 %v1412_v30  ;;  %v1435_v33 = vld [vmem:[#allocation13 + $0xf0] sm:$0xff]  ;;  %v1426_v36 = vld [vmem:[#allocation13 + $0xa8] sm:$0xff] }
 0x1d9   : > { %1007 = vmatpush.bf16.msra.mxu1 %v1420_v31  ;;  %v1411_v34 = vld [vmem:[#allocation13 + $0x30] sm:$0xff]  ;;  %v1417_v43 = vld [vmem:[#allocation13 + $0x60] sm:$0xff] }
 0x1da   : > { %v592_v40 = vunpack.c.l.b16 %v591_v38  ;;  %v593_v41 = vunpack.c.h.b16 %v591_v38  ;;  %v598_v46 = vpack.i.b16 %v597_v45, %v596_v44  ;;  %v1419_v35 = vld [vmem:[#allocation13 + $0x70] sm:$0xff]  ;;  %1021 = vmatpush.bf16.msra.mxu2 %v1427_v32  ;;  %v1410_v38 = vld [vmem:[#allocation13 + $0x28] sm:$0xff]  ;;  %v1424_v44 = vld [vmem:[#allocation13 + $0x98] sm:$0xff] }
 0x1db   : > { %1034 = vmatpush.bf16.msra.mxu3 %v1435_v33  ;;  %v1432_v45 = vld [vmem:[#allocation13 + $0xd8] sm:$0xff] }
 0x1dc   : > { %v594_v42 = vpack.i.b16 %v593_v41, %v592_v40  ;;  %v599_v47 = vunpack.c.l.b16 %v598_v46  ;;  %v600_v48 = vunpack.c.h.b16 %v598_v46  ;;  %995 = vmatpush.bf16.msra.mxu0 %v1411_v34  ;;  %v1425_v40 = vld [vmem:[#allocation13 + $0xa0] sm:$0xff]  ;;  %v1408_v46 = vld [vmem:[#allocation13 + $0x18] sm:$0xff] }
 0x1dd   : > { %1008 = vmatpush.bf16.msra.mxu1 %v1419_v35  ;;  %v1433_v41 = vld [vmem:[#allocation13 + $0xe0] sm:$0xff] }
 0x1de   : > { %612 = vmatmul.bf16.vlgmr.msrb.gmra.mxu2 %v594_v42  ;;  %v601_v49 = vpack.i.b16 %v600_v48, %v599_v47  ;;  %v1409_v42 = vld [vmem:[#allocation13 + $0x20] sm:$0xff]  ;;  %v1416_v47 = vld [vmem:[#allocation13 + $0x58] sm:$0xff] }
 0x1df   : > { %1022 = vmatpush.bf16.msra.mxu2 %v1426_v36  ;;  %1035 = vmatpush.bf16.msra.mxu3 %v1434_v37 }
 0x1e0   : > { %996 = vmatpush.bf16.msra.mxu0 %v1410_v38 }
 0x1e1   : > { %1009 = vmatpush.bf16.msra.mxu1 %v1418_v39 }
 0x1e3   : > { %1023 = vmatpush.bf16.msra.mxu2 %v1425_v40  ;;  %1036 = vmatpush.bf16.msra.mxu3 %v1433_v41 }
 0x1e4   : > { %997 = vmatpush.bf16.msra.mxu0 %v1409_v42 }
 0x1e5   : > { %1010 = vmatpush.bf16.msra.mxu1 %v1417_v43 }
 0x1e7   : > { %1024 = vmatpush.bf16.msra.mxu2 %v1424_v44  ;;  %1037 = vmatpush.bf16.msra.mxu3 %v1432_v45 }
 0x1e8   : > { %998 = vmatpush.bf16.msra.mxu0 %v1408_v46 }
 0x1e9   : > { %1011 = vmatpush.bf16.msra.mxu1 %v1416_v47 }
 0x1ee   : > { %617 = vmatmul.bf16.gmra.mxu2 %v601_v49  ;;  %v1423_v49 = vld [vmem:[#allocation13 + $0x90] sm:$0xff] }
 0x1ef   : > { %1025 = vmatpush.bf16.msra.mxu2 %v1423_v49 }
 0x261   : > { %v613_v50 = vpop.f32.mrf.mxu2 }
 0x262   : > { %v624_v51 = vsel %vm623_vm12, %v613_v50, -inf }
 0x263   : > { %625 = vmax.xlane.f32.xlu1 %v624_v51  ;;  %v1407_v51 = vld [vmem:[#allocation13 + $0x10] sm:$0xff] }
 0x264   : > { %999 = vmatpush.bf16.msra.mxu0 %v1407_v51 }
 0x269   : > { %v615_v52 = vpop.f32.mrf.mxu2 }
 0x26a   : > { %v627_v53 = vsel %vm623_vm12, %v615_v52, -inf }
 0x26b   : > { %628 = vmax.xlane.f32.xlu1 %v627_v53  ;;  %v1422_v53 = vld [vmem:[#allocation13 + $0x88] sm:$0xff] }
 0x26c   : > { %1026 = vmatpush.bf16.msra.mxu2 %v1422_v53 }
 0x271   : > { %v618_v54 = vpop.f32.mrf.mxu2 }
 0x272   : > { %v630_v55 = vsel %vm623_vm12, %v618_v54, -inf }
 0x273   : > { %631 = vmax.xlane.f32.xlu2 %v630_v55  ;;  %v1406_v55 = vld [vmem:[#allocation13 + $0x8] sm:$0xff] }
 0x274   : > { %1000 = vmatpush.bf16.msra.mxu0 %v1406_v55 }
 0x279   : > { %v620_v56 = vpop.f32.mrf.mxu2 }
 0x27a   : > { %v633_v57 = vsel %vm623_vm12, %v620_v56, -inf }
 0x27b   : > { %634 = vmax.xlane.f32.xlu2 %v633_v57  ;;  %v1414_v57 = vld [vmem:[#allocation13 + $0x48] sm:$0xff] }
 0x2d6   : > { %v626_v58 = vpop.xlane.xlu1 %625 }
 0x2d7   : > { %v636_v59 = vsub.f32 %v613_v50, %v626_v58  ;;  %v1431_v50 = vld [vmem:[#allocation13 + $0xd0] sm:$0xff] }
 0x2d8   : > { %1038 = vmatpush.bf16.msra.mxu3 %v1431_v50 }
 0x2d9   : > { %v640_v60 = vmul.f32 1.442695, %v636_v59  ;;  %v1421_v59 = vld [vmem:[#allocation13 + $0x80] sm:$0xff] }
 0x2da   : > { %1027 = vmatpush.bf16.msra.mxu2 %v1421_v59 }
 0x2db   : > { %1551 = vpow2.f32 %v640_v60  ;;  %v1429_v60 = vld [vmem:[#allocation13 + $0xc0] sm:$0xff] }
 0x2de   : > { %v629_v61 = vpop.xlane.xlu1 %628 }
 0x2df   : > { %v637_v62 = vsub.f32 %v615_v52, %v629_v61  ;;  %v1415_v52 = vld [vmem:[#allocation13 + $0x50] sm:$0xff] }
 0x2e0   : > { %1012 = vmatpush.bf16.msra.mxu1 %v1415_v52 }
 0x2e1   : > { %v1552_v63 = vpop.eup %1551  ;;  %v642_v0 = vmul.f32 1.442695, %v637_v62  ;;  %v1405_v62 = vld [vmem:[#allocation13] sm:$0xff] }
 0x2e2   : > { %v648_v1 = vsel %vm623_vm12, %v1552_v63, 0.0  ;;  %1001 = vmatpush.bf16.msra.mxu0 %v1405_v62 }
 0x2e3   : > { %1553 = vpow2.f32 %v642_v0  ;;  %649 = vadd.xlane.f32.xlu0 %v648_v1 }
 0x2e4   : > { %1013 = vmatpush.bf16.msra.mxu1 %v1414_v57 }
 0x2e6   : > { %v632_v2 = vpop.xlane.xlu2 %631 }
 0x2e7   : > { %v638_v3 = vsub.f32 %v618_v54, %v632_v2  ;;  %v1430_v54 = vld [vmem:[#allocation13 + $0xc8] sm:$0xff] }
 0x2e8   : > { %1039 = vmatpush.bf16.msra.mxu3 %v1430_v54 }
 0x2e9   : > { %v1554_v4 = vpop.eup %1553  ;;  %v644_v5 = vmul.f32 1.442695, %v638_v3 }
 0x2ea   : > { %v651_v6 = vsel %vm623_vm12, %v1554_v4, 0.0 }
 0x2eb   : > { %1555 = vpow2.f32 %v644_v5  ;;  %652 = vadd.xlane.f32.xlu1 %v651_v6 }
 0x2ec   : > { %1040 = vmatpush.bf16.msra.mxu3 %v1429_v60 }
 0x2ee   : > { %v635_v7 = vpop.xlane.xlu2 %634 }
 0x2ef   : > { %v639_v8 = vsub.f32 %v620_v56, %v635_v7 }
 0x2f1   : > { %v1556_v9 = vpop.eup %1555  ;;  %v646_v10 = vmul.f32 1.442695, %v639_v8 }
 0x2f2   : > { %v654_v11 = vsel %vm623_vm12, %v1556_v9, 0.0 }
 0x2f3   : > { %1557 = vpow2.f32 %v646_v10  ;;  %655 = vadd.xlane.f32.xlu2 %v654_v11 }
 0x2f9   : > { %v1558_v12 = vpop.eup %1557 }
 0x2fa   : > { %v657_v13 = vsel %vm623_vm12, %v1558_v12, 0.0 }
 0x2fb   : > { %658 = vadd.xlane.f32.xlu0 %v657_v13 }
 0x356   : > { %v650_v14 = vpop.xlane.xlu0 %649 }
 0x357   : > { %1559 = vrcp.f32 %v650_v14 }
 0x35d   : > { %v1560_v16 = vpop.eup %1559 }
 0x35e   : > { %v653_v15 = vpop.xlane.xlu1 %652  ;;  %v664_v18 = vmul.f32 %v1560_v16, %v1552_v63  ;;  %v1413_v63 = vld [vmem:[#allocation13 + $0x40] sm:$0xff] }
 0x35f   : > { %1561 = vrcp.f32 %v653_v15  ;;  %1014 = vmatpush.bf16.msra.mxu1 %v1413_v63 }
 0x365   : > { %v1562_v17 = vpop.eup %1561 }
 0x366   : > { %v665_v19 = vmul.f32 %v1562_v17, %v1554_v4  ;;  %v656_v21 = vpop.xlane.xlu2 %655 }
 0x367   : > { %1563 = vrcp.f32 %v656_v21 }
 0x368   : > { %v668_v20 = vpack.c.bf16 %v665_v19, %v664_v18 }
 0x36a   : > { %1255 = vmatmul.msk.bf16.vlgmr.msrb.gmra.mxu3 %vm623_vm12, %v668_v20 }
 0x36d   : > { %v1564_v23 = vpop.eup %1563 }
 0x36e   : > { %v659_v22 = vpop.xlane.xlu0 %658  ;;  %v666_v25 = vmul.f32 %v1564_v23, %v1556_v9 }
 0x36f   : > { %1565 = vrcp.f32 %v659_v22 }
 0x375   : > { %v1566_v24 = vpop.eup %1565 }
 0x376   : > { %v667_v26 = vmul.f32 %v1566_v24, %v1558_v12 }
 0x378   : > { %v669_v27 = vpack.c.bf16 %v667_v26, %v666_v25 }
 0x37a   : > { %1256 = vmatmul.msk.bf16.gmra.mxu3 %vm623_vm12, %v669_v27 }
 0x3ed   : > { %v689_v48 = vpop.f32.mrf.mxu3 }
 0x3ee   : > { %v699_v56 = vpack.c.bf16 %v689_v48, %v689_v48 }
 0x3f0   : > { %v707_v0 = vunpack.c.l.b16 %v699_v56 }
 0x3f5   : > { %v691_v58 = vpop.f32.mrf.mxu3 }
 0x3f6   : > { %v700_v61 = vpack.c.bf16 %v691_v58, %v691_v58 }
 0x3f8   : > { %v708_v1 = vunpack.c.l.b16 %v700_v61 }
 0x3fa   : > { %v711_v2 = vpack.c.b16 %v708_v1, %v707_v0 }
 0x3fc   : > { %v714_v3 = vunpack.i.h.s16 %v711_v2 }
 0x3fd   : > { %v694_v4 = vpop.f32.mrf.mxu3 }
 0x3fe   : > { %v1257_v5 = vpack.c.b16 %v714_v3, %v711_v2  ;;  %v701_v8 = vpack.c.bf16 %v694_v4, %v694_v4 }
 0x400   : > { %v717_v6 = vunpack.i.h.s16 %v1257_v5  ;;  %v709_v11 = vunpack.c.l.b16 %v701_v8 }
 0x402   : > { %v1258_v7 = vpack.c.b16 %v717_v6, %v1257_v5 }
 0x404   : > { %790 = vst [vmem:[#allocation1] ss:$4 sm:$0xff] %v1258_v7 }
 0x405   : > { %v696_v9 = vpop.f32.mrf.mxu3 }
 0x406   : > { %v702_v10 = vpack.c.bf16 %v696_v9, %v696_v9 }
 0x408   : > { %v710_v12 = vunpack.c.l.b16 %v702_v10 }
 0x40a   : > { %v712_v13 = vpack.c.b16 %v710_v12, %v709_v11 }
 0x40c   : > { %v720_v14 = vunpack.i.h.s16 %v712_v13 }
 0x40e   : > { %v1259_v15 = vpack.c.b16 %v720_v14, %v712_v13 }
 0x410   : > { %v723_v16 = vunpack.i.h.s16 %v1259_v15 }
 0x412   : > { %v1260_v17 = vpack.c.b16 %v723_v16, %v1259_v15 }
 0x414   : > { %793 = vst [vmem:[#allocation1 + $0x1] ss:$4 sm:$0xff] %v1260_v17 }
 0x41b   : > { %v794_v18 = vld.sshfl [vmem:[#allocation1] sm:$0xff pattern:$0x73625140]  ;;  %v795_v19 = vld.sshfl [vmem:[#allocation1 + $0x8] sm:$0xff pattern:$0x73625140] }
 0x41c   : > { %1002 = vmatmul.bf16.vlgmr.msra.gmra.mxu0 %v794_v18  ;;  %1015 = vmatmul.bf16.vlgmr.msra.gmra.mxu1 %v795_v19  ;;  %v796_v20 = vld.sshfl [vmem:[#allocation1 + $0x10] sm:$0xff pattern:$0x73625140]  ;;  %v797_v21 = vld.sshfl [vmem:[#allocation1 + $0x18] sm:$0xff pattern:$0x73625140] }
 0x41d   : > { %1028 = vmatmul.bf16.vlgmr.msra.gmra.mxu2 %v796_v20  ;;  %1041 = vmatmul.bf16.vlgmr.msra.gmra.mxu3 %v797_v21 }
 0x499   : > { %v1003_v22 = vpop.f32.mrf.mxu0  ;;  %v1016_v23 = vpop.f32.mrf.mxu1 }
 0x49a   : > { %v1017_v24 = vadd.f32 %v1016_v23, %v1003_v22 }
 0x4a0   : > { %v1029_v25 = vpop.f32.mrf.mxu2  ;;  %v1042_v26 = vpop.f32.mrf.mxu3 }
 0x4a1   : > { %v1030_v27 = vadd.f32 %v1029_v25, %v1017_v24  ;;  %v1005_v28 = vpop.f32.mrf.mxu0  ;;  %v1018_v29 = vpop.f32.mrf.mxu1 }
 0x4a3   : > { %v1043_v30 = vadd.f32 %v1042_v26, %v1030_v27 }
 0x4a5   : > { %v1046_v31 = vpack.c.bf16 %v1043_v30, %v1043_v30 }
 0x4a7   : > { %1047 = vst [vmem:[%s346_s17] sm:$0xf] %v1046_v31 }
 0x4a8   : > { %v1031_v32 = vpop.f32.mrf.mxu2  ;;  %v1044_v33 = vpop.f32.mrf.mxu3 }
 0x4a9   : > { %1744 = shalt.err (!%p1741_p13)
}
 0x4aa   : > { %1455 = dma.vmem_to_hbm [thread:$0]  (%p1947_p0), %s1063_s18, 64, %s1065_s29, %s1049_s24  }
 0x4ab PF: > { %s1076_s30 = sand.u32 1, %s1787_s21   ;;  %p1475_p2 = pnand %p1191_p4, %p1954_p6 }
 0x4ac   : > { %s1077_s7 = scalar_lea.sflag [#allocation7], %s1076_s30 }
 0x4ad   : > { %p1476_p5 = pneg %p1475_p2 }
 0x4af   : > { %1782 = dma.done.wait (%p1476_p5), %s1077_s7, 64  }
 0x4b0   : > { %1784 = vsyncadd (%p1476_p5), %s1077_s7, 4294967232  ;;  %s24_s26 = sadd.s32 1, %s1807_s26   ;;  %s2066_s21 = smov %s1791_s22 }
 0x4b1   : > { %p21_p7 = scmp.ge.s32.totalorder %s24_s26, 4   ;;  %s2067_s22 = smov %s1795_s23 }
 0x4b2   : > { %s2068_s23 = smov %s1952_s11  ;;  %s2069_s24 = smov %s1803_s25 }
 0x4b3   : > { %s2070_s25 = smov %s2072_s19  ;;  %23 = sbr.rel (!%p21_p7) target bundleno = 8 (0x8), region = 111 }
 0x4b8   :  { %1083 = vsyncpa [#allocation6], 1 }
 0x4b9   :  { %1085 = vsyncpa [#allocation6 + $0x1], 1 }
 0x4ba   :  { %1086 = vsyncpa [#allocation9], 1 }
 0x4bb   :  { %1087 = vsyncpa [#allocation12], 1 }
 0x4bc   :  { %1088 = vsyncpa [#allocation7], 1 }
 0x4bd   :  { %1090 = vsyncpa [#allocation7 + $0x1], 1 }

// kernel: tpu_custom_call.1
= control target key start
LH: loop header
LB: loop body
LE: loop exit
PB: predicated region body
PF: predicated region fallthrough
CT: control target
= control target key end

     0   :  { %11 = vsyncpa [#allocation6], 0  ;;  %s2053_s0 = inlined_call_operand.hbm [shape: bf16[2,8,32], index: 0, kind: input, shape index: {}]   ;;  %s2054_s1 = inlined_call_operand.hbm [shape: bf16[1,32], index: 1, kind: input, shape index: {}]   ;;  %s2055_s2 = inlined_call_operand.vmem [shape: bf16[1,32], index: 2, kind: input, shape index: {}]   ;;  %s2056_s3 = inlined_call_operand.hbm [shape: bf16[32,512], index: 3, kind: input, shape index: {}]   ;;  %s2057_s4 = inlined_call_operand.hbm [shape: bf16[32,256], index: 4, kind: input, shape index: {}]   ;;  %s2058_s5 = inlined_call_operand.hbm [shape: bf16[512,128], index: 5, kind: input, shape index: {}]   ;;  %s2059_s6 = inlined_call_operand.hbm [shape: bf16[2,8,128], index: 6, kind: output, shape index: {}]  }
   0x1   :  { %13 = vsyncpa [#allocation6 + $0x1], 0 }
   0x2   :  { %14 = vsyncpa [#allocation9], 0 }
   0x3   :  { %15 = vsyncpa [#allocation12], 0 }
   0x4   :  { %16 = vsyncpa [#allocation7], 0 }
   0x5   :  { %18 = vsyncpa [#allocation7 + $0x1], 0  ;;  %s1855_s21 = smov 0   ;;  %s1857_s22 = smov 0  }
   0x6   :  { %s1859_s23 = smov 0   ;;  %s1861_s24 = smov 0  }
   0x7   :  { %s1863_s25 = smov 0   ;;  %s1865_s26 = smov 0  }
   0x8 LB: > { %s1184_s27 = sadd.s32 4294967295, %s1807_s26   ;;  %p1186_p0 = scmp.ge.s32.totalorder %s1807_s26, 1  ;;  %s1807_s26 = sphi %s1865_s26, %s24_s26   ;;  %s1803_s25 = sphi %s1863_s25, %s2070_s25   ;;  %s1799_s24 = sphi %s1861_s24, %s2069_s24   ;;  %s1795_s23 = sphi %s1859_s23, %s2068_s23   ;;  %s1791_s22 = sphi %s1857_s22, %s2067_s22   ;;  %s1787_s21 = sphi %s1855_s21, %s2066_s21  }
   0x9   : > { %p1889_p1 = scmp.eq.s32.totalorder %s1184_s27, 0  ;;  %p200_p2 = scmp.lt.s32.totalorder %s1807_s26, 3 }
   0xa   : > { %s212_s7 = sshll.u32 %s2054_s1, 4  ;;  %p1191_p4 = scmp.ge.s32.totalorder %s1807_s26, 2  ;;  %s213_s7 = int_to_ptr.hbm [resolvable:$true] %s212_s7 }
   0xb   : > { %p1897_p3 = pnand %p1186_p0, %p200_p2  ;;  %s1809_s9 = smov [#allocation8]  }
   0xc   : > { %s214_s10 = sshll.u32 %s1809_s9, 4  ;;  %s240_s13 = sshll.u32 %s2057_s4, 4  ;;  %s215_s10 = int_to_ptr.vmem [resolvable:$true] %s214_s10  ;;  %s241_s13 = int_to_ptr.hbm [resolvable:$true] %s240_s13 }
   0xd   : > { %p1457_p5 = pneg %p1897_p3  ;;  %s1810_s15 = smov [#allocation11]  }
   0xe   : > { %s242_s16 = sshll.u32 %s1810_s15, 4  ;;  %s1811_s17 = smov 128   ;;  %s243_s16 = int_to_ptr.vmem [resolvable:$true] %s242_s16 }
   0xf   : > { %p1909_p6 = pnand %p1457_p5, %p1889_p1  ;;  %s1812_s18 = smov 8  }
  0x10   : > { %s226_s29 = sshll.u32 %s2056_s3, 4  ;;  %s1813_s30 = smov [#allocation10]   ;;  %s227_s29 = int_to_ptr.hbm [resolvable:$true] %s226_s29 }
  0x11   : > { %1460 = dma.hbm_to_vmem [thread:$0]  (!%p1909_p6), %s213_s7, 16, %s215_s10, [#allocation9]  }
  0x12   : > { %1466 = dma.hbm_to_vmem [thread:$0]  (!%p1909_p6), %s241_s13, 512, %s243_s16, [#allocation12], %s1811_s17, %s1811_s17, %s1812_s18  }
  0x13   : > { %s228_s9 = sshll.u32 %s1813_s30, 4  ;;  %s254_s7 = sshll.u32 %s2058_s5, 4  ;;  %s229_s9 = int_to_ptr.vmem [resolvable:$true] %s228_s9  ;;  %s255_s7 = int_to_ptr.hbm [resolvable:$true] %s254_s7 }
  0x14   : > { %s1814_s10 = smov 256   ;;  %s1815_s13 = smov 16  }
  0x15   : > { %1463 = dma.hbm_to_vmem [thread:$0]  (!%p1909_p6), %s227_s29, 1024, %s229_s9, [#allocation9], %s1814_s10, %s1814_s10, %s1815_s13  }
  0x16   : > { %s1816_s15 = smov [#allocation13]   ;;  %s1817_s17 = smov 64  }
  0x17   : > { %s256_s16 = sshll.u32 %s1816_s15, 4  ;;  %s1818_s18 = smov 4   ;;  %s257_s16 = int_to_ptr.vmem [resolvable:$true] %s256_s16 }
  0x18   : > { %1469 = dma.hbm_to_vmem [thread:$0]  (!%p1909_p6), %s255_s7, 4096, %s257_s16, [#allocation12], %s1817_s17, %s1817_s17, %s1818_s18  }
  0x19   : > { %s36_s19 = sadd.s32 1, %s1803_s25  ;;  %s1185_s20 = sadd.s32 4294967294, %s1807_s26  }
  0x1a   : > { %p38_p7 = scmp.ge.s32.totalorder %s36_s19, 2  ;;  %s43_s30 = sadd.s32 1, %s1795_s23 }
  0x1b   : > { %p50_p8 = scmp.ne.s32.totalorder %s1795_s23, %s1791_s22  ;;  %p51_p9 = scmp.eq.s32.totalorder %s1807_s26, 0 }
  0x1c   : > { %s2072_s19 = smov (%p38_p7, %s36_s19), 0  ;;  %p56_p10 = scmp.ne.s32.totalorder %s1791_s22, %s1787_s21 }
  0x1d   : > { %s40_s29 = ssub.s32 %s1803_s25, %s2072_s19  ;;  %p187_p11 = scmp.eq.s32.totalorder %s1184_s27, 1 }
  0x1e   : > { %p41_p12 = scmp.eq.s32.totalorder %s40_s29, 0  ;;  %p1943_p13 = por %p1889_p1, %p56_p10 }
  0x1f   : > { %p1947_p0 = por %p187_p11, %p50_p8  ;;  %p193_p2 = scmp.eq.s32.totalorder %s1185_s20, 1 }
  0x20   : > { %s1952_s11 = scalar_select %p41_p12, %s1795_s23, %s43_s30  }
  0x21   : > { %p52_p5 = por %p51_p9, %p50_p8  ;;  %p1954_p6 = por %p193_p2, %p56_p10 }
  0x22   : > { %s270_s7 = sand.u32 1, %s1795_s23   ;;  %s1193_s27 = sshll.u32 %s1803_s25, 2 }
  0x23   : > { %p1482_p7 = scmp.lt.s32.totalorder %s1807_s26, 2  ;;  %s1192_s10 = sshll.u32 %s270_s7, 2 }
  0x24   : > { %s278_s16 = scalar_lea.hbm %s2053_s0, %s1193_s27  ;;  %s274_s18 = scalar_lea.vmem [#allocation5], %s1192_s10 }
  0x25   : > { %s280_s17 = sshll.u32 %s278_s16, 4  ;;  %s282_s29 = sshll.u32 %s274_s18, 4  ;;  %s281_s17 = int_to_ptr.hbm [resolvable:$true] %s280_s17  ;;  %s283_s29 = int_to_ptr.vmem [resolvable:$true] %s282_s29 }
  0x26   : > { %p1471_p11 = pnand %p1482_p7, %p52_p5  ;;  %s271_s20 = scalar_lea.sflag [#allocation6], %s270_s7 }
  0x27   : > { %291 = sbr.rel (%p1897_p3) target bundleno = 1195 (0x4ab), region = 44  ;;  %s1967_s30 = sand.u32 (!%p1897_p3), 1, %s1791_s22  }
  0x28   : > { %1473 = dma.hbm_to_vmem [thread:$0]  (!%p1471_p11), %s281_s17, 64, %s283_s29, %s271_s20  }
  0x29   : > { %s1195_s13 = sshll.u32 (!%p1897_p3), %s1967_s30, 2  ;;  %s294_s27 = scalar_lea.sflag (!%p1897_p3), [#allocation6], %s1967_s30 }
  0x2a   : > { %s297_s10 = scalar_lea.vmem (!%p1897_p3), [#allocation5], %s1195_s13 }
  0x2c   : > { %1770 = dma.done.wait (%p1943_p13), %s294_s27, 64  }
  0x2d   : > { %1772 = vsyncadd (%p1943_p13), %s294_s27, 4294967232 }
  0x2e   : > { %1774 = dma.done.wait (%p1889_p1), [#allocation9], 1040  }
  0x2f   : > { %1776 = vsyncadd (%p1889_p1), [#allocation9], 4294966256 }
  0x30   : > { %1778 = dma.done.wait (%p1889_p1), [#allocation12], 4608  }
  0x31   : > { %1780 = vsyncadd (%p1889_p1), [#allocation12], 4294962688  ;;  %v356_v0 = vld [vmem:[%s297_s10] sm:$0xf]  ;;  %vm358_vm0 = vcmask 261120   ;;  %v1819_v3 = vmov 32.0  }
  0x32   : > { %v357_v1 = vunpack.c.l.bf16 %v356_v0  ;;  %1547 = vrcp.f32 %v1819_v3  ;;  %v1211_v15 = vld [vmem:[#allocation11 + $0x10] sm:$0xf]  ;;  %v1396_v16 = vld [vmem:[#allocation11 + $0x14] sm:$0xf0]  ;;  %v1395_v17 = vld [vmem:[#allocation11 + $0x14] sm:$0xf] }
  0x33   : > { %v1212_v18 = vor.u32 %v1396_v16, %v1211_v15  ;;  %v1213_v19 = vld [vmem:[#allocation11 + $0x18] sm:$0xf0]  ;;  %v1203_v20 = vld [vmem:[#allocation11] sm:$0xf]  ;;  %v1394_v21 = vld [vmem:[#allocation11 + $0x4] sm:$0xf0] }
  0x34   : > { %v359_v2 = vsel %vm358_vm0, %v357_v1, 0.0  ;;  %v1216_v22 = vor.u32 %v1395_v17, %v1213_v19  ;;  %v1393_v23 = vld [vmem:[#allocation11 + $0x4] sm:$0xf]  ;;  %v1205_v24 = vld [vmem:[#allocation11 + $0x8] sm:$0xf0]  ;;  %v1204_v25 = vor.u32 %v1394_v21, %v1203_v20  ;;  %vm393_vm5 = vcmask 257024  }
  0x35   : > { %360 = vadd.xlane.f32.xlu0 %v359_v2  ;;  %428 = vmatpush.bf16.msra.mxu0 %v1212_v18  ;;  %v1208_v26 = vor.u32 %v1393_v23, %v1205_v24  ;;  %v1237_v27 = vld [vmem:[#allocation10 + $0x20] sm:$0xf]  ;;  %v1403_v28 = vld [vmem:[#allocation10 + $0x2c] sm:$0xf0]  ;;  %v1401_v30 = vld [vmem:[#allocation10 + $0x24] sm:$0xf] }
  0x36   : > { %441 = vmatpush.bf16.msra.mxu1 %v1216_v22  ;;  %v1238_v29 = vor.u32 %v1403_v28, %v1237_v27  ;;  %v1239_v31 = vld [vmem:[#allocation10 + $0x30] sm:$0xf0]  ;;  %v1245_v32 = vld [vmem:[#allocation10 + $0x28] sm:$0xf]  ;;  %v1404_v33 = vld [vmem:[#allocation10 + $0x34] sm:$0xf0] }
  0x37   : > { %v1402_v34 = vld [vmem:[#allocation10 + $0x2c] sm:$0xf]  ;;  %v1242_v35 = vor.u32 %v1401_v30, %v1239_v31  ;;  %v1246_v37 = vor.u32 %v1404_v33, %v1245_v32  ;;  %v1247_v38 = vld [vmem:[#allocation10 + $0x38] sm:$0xf0]  ;;  %v1221_v39 = vld [vmem:[#allocation10] sm:$0xf] }
  0x38   : > { %v1548_v4 = vpop.eup %1547  ;;  %517 = vmatpush.bf16.msra.mxu2 %v1238_v29  ;;  %v1399_v40 = vld [vmem:[#allocation10 + $0xc] sm:$0xf0]  ;;  %v1250_v42 = vor.u32 %v1402_v34, %v1247_v38  ;;  %v1397_v44 = vld [vmem:[#allocation10 + $0x4] sm:$0xf]  ;;  %v1223_v45 = vld [vmem:[#allocation10 + $0x10] sm:$0xf0] }
  0x39   : > { %v363_v5 = vmul.f32 32.0, %v1548_v4  ;;  %vm367_vm1 = vweird.f32 %v1548_v4  ;;  %429 = vmatpush.bf16.msra.mxu0 %v1204_v25  ;;  %530 = vmatpush.bf16.msra.mxu3 %v1242_v35  ;;  %v1222_v43 = vor.u32 %v1399_v40, %v1221_v39  ;;  %v1226_v46 = vor.u32 %v1397_v44, %v1223_v45  ;;  %v1229_v48 = vld [vmem:[#allocation10 + $0x8] sm:$0xf]  ;;  %v1400_v49 = vld [vmem:[#allocation10 + $0x14] sm:$0xf0]  ;;  %s1390_s14 = sshll.u32 %s1799_s24, 2 }
  0x3a   : > { %442 = vmatpush.bf16.msra.mxu1 %v1208_v26  ;;  %v1398_v50 = vld [vmem:[#allocation10 + $0xc] sm:$0xf]  ;;  %v1230_v51 = vor.u32 %v1400_v49, %v1229_v48  ;;  %v1231_v52 = vld [vmem:[#allocation10 + $0x18] sm:$0xf0]  ;;  %v354_v59 = vld [vmem:[%s2055_s2] sm:$0x1]  ;;  %s1060_s16 = scalar_lea.hbm %s2059_s6, %s1390_s14 }
  0x3b   : > { %v364_v6 = vsub.f32 1.0, %v363_v5  ;;  %v1234_v53 = vor.u32 %v1398_v50, %v1231_v52  ;;  %v352_v57 = vld [vmem:[#allocation8] sm:$0x1]  ;;  %v355_v62 = vunpack.c.l.bf16 %v354_v59  ;;  %vm578_vm6 = vcmask 1043456   ;;  %s346_s17 = scalar_lea.vmem [#allocation14], %s1195_s13  ;;  %s1064_s29 = sshll.u32 %s1060_s16, 4  ;;  %s1065_s29 = int_to_ptr.hbm [resolvable:$true] %s1064_s29 }
  0x3c   : > { %518 = vmatpush.bf16.msra.mxu2 %v1222_v43  ;;  %v353_v60 = vunpack.c.l.bf16 %v352_v57  ;;  %vm570_vm7 = vcmask 1041408   ;;  %vm574_vm8 = vcmask 1045508   ;;  %vm583_vm9 = vcmask 1045504   ;;  %s1062_s18 = sshll.u32 %s346_s17, 4  ;;  %s1049_s24 = scalar_lea.sflag [#allocation7], %s1967_s30  ;;  %s1063_s18 = int_to_ptr.vmem [resolvable:$true] %s1062_s18 }
  0x3d   : > { %v365_v7 = vmul.f32 %v1548_v4, %v364_v6  ;;  %543 = vmatpush.bf16.msrb.mxu0 %v1246_v37  ;;  %531 = vmatpush.bf16.msra.mxu3 %v1226_v46  ;;  %v390_v3 = vperm.slane %v355_v62, 0  ;;  %vm581_vm10 = vcmask 1043458   ;;  %vm585_vm11 = vcmask 1045506   ;;  %s1731_s20 = sshra.s32 %s1065_s29, 4  ;;  %s1737_s13 = scalar_lea.hbm %s2059_s6, 8  ;;  %s1732_s20 = int_to_ptr.hbm [resolvable:$true] %s1731_s20 }
  0x3e   : > { %556 = vmatpush.bf16.msrb.mxu1 %v1250_v42  ;;  %v388_v0 = vperm.slane %v353_v60, 0  ;;  %vm623_vm12 = vcmask 64512   ;;  %s1733_s27 = scalar_lea.hbm %s1732_s20, 4  ;;  %p1738_p9 = scmp.lt.s32.totalorder %s1732_s20, %s2059_s6 }
  0x3f   : > { %v366_v8 = vadd.f32 %v1548_v4, %v365_v7  ;;  %p1734_p1 = scmp.ne.s32.totalorder %s1732_s20, %s1733_s27  ;;  %p1739_p10 = scmp.lt.s32.totalorder %s1737_s13, %s1733_s27 }
  0x41   : > { %v368_v9 = vsel %vm367_vm1, %v1548_v4, %v366_v8  ;;  %544 = vmatpush.bf16.msrb.mxu0 %v1230_v51  ;;  %p1735_p3 = pnand %p1734_p1, %p1947_p0  ;;  %p1740_p12 = por %p1739_p10, %p1738_p9 }
  0x42   : > { %557 = vmatpush.bf16.msrb.mxu1 %v1234_v53 }
  0x43   : > { %p1736_p8 = pneg %p1735_p3 }
  0x45   : > { %p1741_p13 = pnand %p1740_p12, %p1736_p8 }
  0xa8   : > { %v361_v10 = vpop.xlane.xlu0 %360 }
  0xa9   : > { %v369_v11 = vmul.f32 %v368_v9, %v361_v10 }
  0xab   : > { %v1986_v12 = vsub.f32 %v357_v1, %v369_v11 }
  0xad   : > { %v371_v13 = vmul.f32 %v1986_v12, %v1986_v12 }
  0xaf   : > { %v372_v14 = vsel %vm358_vm0, %v371_v13, 0.0 }
  0xb0   : > { %373 = vadd.xlane.f32.xlu0 %v372_v14 }
 0x123   : > { %v374_v36 = vpop.xlane.xlu0 %373 }
 0x124   : > { %v375_v41 = vmul.f32 %v374_v36, %v368_v9 }
 0x126   : > { %v376_v47 = vadd.f32 1e-05, %v375_v41 }
 0x128   : > { %1549 = vrsqrt.f32 %v376_v47  ;;  %vm383_vm3 = vweird.f32 %v376_v47 }
 0x12e   : > { %v1550_v54 = vpop.eup %1549 }
 0x12f   : > { %v378_v55 = vmul.f32 %v1550_v54, %v376_v47  ;;  %vm384_vm2 = vweird.f32 %v1550_v54 }
 0x130   : > { %vm385_vm4 = vmor %vm383_vm3, %vm384_vm2 }
 0x131   : > { %v379_v56 = vmul.f32 %v1550_v54, %v378_v55 }
 0x133   : > { %v380_v58 = vmul.f32 0.5, %v379_v56 }
 0x135   : > { %v381_v61 = vsub.f32 1.5, %v380_v58 }
 0x137   : > { %v382_v63 = vmul.f32 %v1550_v54, %v381_v61 }
 0x139   : > { %v386_v1 = vsel %vm385_vm4, %v1550_v54, %v382_v63 }
 0x13a   : > { %v387_v2 = vmul.f32 %v386_v1, %v1986_v12 }
 0x13c   : > { %v389_v4 = vmul.f32 %v388_v0, %v387_v2 }
 0x13e   : > { %v391_v5 = vadd.f32 %v390_v3, %v389_v4 }
 0x140   : > { %v392_v6 = vpack.c.bf16 %v391_v5, %v391_v5 }
 0x142   : > { %394 = vst.msk [vmem:[#allocation2] sm:$0xf] %vm393_vm5, %v392_v6  ;;  %1217 = vmatmul.msk.bf16.vlgmr.msra.gmra.mxu0 %vm358_vm0, %v392_v6  ;;  %1218 = vmatmul.msk.bf16.vlgmr.msra.gmra.mxu1 %vm358_vm0, %v392_v6 }
 0x149   : > { %v458_v7 = vld [vmem:[#allocation2] sm:$0xf] }
 0x14a   : > { %1251 = vmatmul.msk.bf16.vlgmr.msra.gmra.mxu2 %vm358_vm0, %v458_v7  ;;  %1252 = vmatmul.msk.bf16.vlgmr.msra.gmra.mxu3 %vm358_vm0, %v458_v7 }
 0x152   : > { %1253 = vmatmul.msk.bf16.vlgmr.msrb.gmra.mxu0 %vm358_vm0, %v458_v7  ;;  %1254 = vmatmul.msk.bf16.vlgmr.msrb.gmra.mxu1 %vm358_vm0, %v458_v7 }
 0x1bf   : > { %v431_v8 = vpop.f32.mrf.mxu0  ;;  %v444_v9 = vpop.f32.mrf.mxu1 }
 0x1c0   : > { %v448_v10 = vmul.f32 0.35355338, %v431_v8  ;;  %v451_v11 = vpack.c.bf16 %v444_v9, %v444_v9 }
 0x1c2   : > { %v449_v12 = vpack.c.bf16 %v448_v10, %v448_v10  ;;  %452 = vst [vmem:[#allocation4] sm:$0xf] %v451_v11 }
 0x1c4   : > { %450 = vst [vmem:[#allocation3] sm:$0xf] %v449_v12 }
 0x1c7   : > { %v433_v13 = vpop.f32.mrf.mxu0  ;;  %v446_v14 = vpop.f32.mrf.mxu1 }
 0x1c9   : > { %v670_v15 = vld [vmem:[#allocation4] sm:$0xf] }
 0x1ca   : > { %v678_v16 = vsel %vm578_vm6, %v670_v15, 0 }
 0x1cb   : > { %687 = vmatpush.bf16.msrb.mxu3 %v678_v16  ;;  %v603_v17 = vld [vmem:[#allocation3] sm:$0xf] }
 0x1cc   : > { %611 = vmatpush.bf16.xpose.msrb.mxu2 %v603_v17 }
 0x1cd   : > { %v520_v18 = vpop.f32.mrf.mxu2  ;;  %v533_v19 = vpop.f32.mrf.mxu3 }
 0x1ce   : > { %v563_v20 = vpack.c.bf16 %v533_v19, %v520_v18 }
 0x1cf   : > { %v546_v21 = vpop.f32.mrf.mxu0  ;;  %v559_v22 = vpop.f32.mrf.mxu1 }
 0x1d0   : > { %v567_v23 = vrot.slane %v563_v20, 2  ;;  %v564_v24 = vpack.c.bf16 %v559_v22, %v546_v21 }
 0x1d2   : > { %v568_v25 = vrot.slane %v564_v24, 4  ;;  %v569_v26 = vrot.slane %v564_v24, 6  ;;  %v573_v27 = vsel %vm570_vm7, %v563_v20, %v567_v23  ;;  %v582_v37 = vsel %vm581_vm10, %v563_v20, %v567_v23 }
 0x1d4   : > { %v577_v28 = vsel %vm574_vm8, %v568_v25, %v569_v26  ;;  %v584_v32 = vsel %vm583_vm9, %v569_v26, %v568_v25 }
 0x1d5   : > { %v579_v29 = vsel %vm578_vm6, %v573_v27, %v577_v28  ;;  %v522_v30 = vpop.f32.mrf.mxu2  ;;  %v535_v31 = vpop.f32.mrf.mxu3  ;;  %v586_v39 = vsel %vm585_vm11, %v582_v37, %v584_v32  ;;  %v1428_v28 = vld [vmem:[#allocation13 + $0xb8] sm:$0xff]  ;;  %v1427_v32 = vld [vmem:[#allocation13 + $0xb0] sm:$0xff]  ;;  %v1434_v37 = vld [vmem:[#allocation13 + $0xe8] sm:$0xff] }
 0x1d6   : > { %v589_v33 = vunpack.c.l.b16 %v579_v29  ;;  %v590_v34 = vunpack.c.h.b16 %v579_v29  ;;  %v588_v43 = vrot.slane %v586_v39, 2  ;;  %v1436_v29 = vld [vmem:[#allocation13 + $0xf8] sm:$0xff]  ;;  %1020 = vmatpush.bf16.msra.mxu2 %v1428_v28  ;;  %v1418_v39 = vld [vmem:[#allocation13 + $0x68] sm:$0xff] }
 0x1d7   : > { %v548_v35 = vpop.f32.mrf.mxu0  ;;  %v561_v36 = vpop.f32.mrf.mxu1  ;;  %v1412_v30 = vld [vmem:[#allocation13 + $0x38] sm:$0xff]  ;;  %1033 = vmatpush.bf16.msra.mxu3 %v1436_v29 }
 0x1d8   : > { %v591_v38 = vpack.i.b16 %v590_v34, %v589_v33  ;;  %v596_v44 = vunpack.c.l.b16 %v588_v43  ;;  %v597_v45 = vunpack.c.h.b16 %v588_v43  ;;  %v1420_v31 = vld [vmem:[#allocation13 + $0x78] sm:$0xff]  ;;  %994 = vmatpush.bf16.msra.mxu0 %v1412_v30  ;;  %v1435_v33 = vld [vmem:[#allocation13 + $0xf0] sm:$0xff]  ;;  %v1426_v36 = vld [vmem:[#allocation13 + $0xa8] sm:$0xff] }
 0x1d9   : > { %1007 = vmatpush.bf16.msra.mxu1 %v1420_v31  ;;  %v1411_v34 = vld [vmem:[#allocation13 + $0x30] sm:$0xff]  ;;  %v1417_v43 = vld [vmem:[#allocation13 + $0x60] sm:$0xff] }
 0x1da   : > { %v592_v40 = vunpack.c.l.b16 %v591_v38  ;;  %v593_v41 = vunpack.c.h.b16 %v591_v38  ;;  %v598_v46 = vpack.i.b16 %v597_v45, %v596_v44  ;;  %v1419_v35 = vld [vmem:[#allocation13 + $0x70] sm:$0xff]  ;;  %1021 = vmatpush.bf16.msra.mxu2 %v1427_v32  ;;  %v1410_v38 = vld [vmem:[#allocation13 + $0x28] sm:$0xff]  ;;  %v1424_v44 = vld [vmem:[#allocation13 + $0x98] sm:$0xff] }
 0x1db   : > { %1034 = vmatpush.bf16.msra.mxu3 %v1435_v33  ;;  %v1432_v45 = vld [vmem:[#allocation13 + $0xd8] sm:$0xff] }
 0x1dc   : > { %v594_v42 = vpack.i.b16 %v593_v41, %v592_v40  ;;  %v599_v47 = vunpack.c.l.b16 %v598_v46  ;;  %v600_v48 = vunpack.c.h.b16 %v598_v46  ;;  %995 = vmatpush.bf16.msra.mxu0 %v1411_v34  ;;  %v1425_v40 = vld [vmem:[#allocation13 + $0xa0] sm:$0xff]  ;;  %v1408_v46 = vld [vmem:[#allocation13 + $0x18] sm:$0xff] }
 0x1dd   : > { %1008 = vmatpush.bf16.msra.mxu1 %v1419_v35  ;;  %v1433_v41 = vld [vmem:[#allocation13 + $0xe0] sm:$0xff] }
 0x1de   : > { %612 = vmatmul.bf16.vlgmr.msrb.gmra.mxu2 %v594_v42  ;;  %v601_v49 = vpack.i.b16 %v600_v48, %v599_v47  ;;  %v1409_v42 = vld [vmem:[#allocation13 + $0x20] sm:$0xff]  ;;  %v1416_v47 = vld [vmem:[#allocation13 + $0x58] sm:$0xff] }
 0x1df   : > { %1022 = vmatpush.bf16.msra.mxu2 %v1426_v36  ;;  %1035 = vmatpush.bf16.msra.mxu3 %v1434_v37 }
 0x1e0   : > { %996 = vmatpush.bf16.msra.mxu0 %v1410_v38 }
 0x1e1   : > { %1009 = vmatpush.bf16.msra.mxu1 %v1418_v39 }
 0x1e3   : > { %1023 = vmatpush.bf16.msra.mxu2 %v1425_v40  ;;  %1036 = vmatpush.bf16.msra.mxu3 %v1433_v41 }
 0x1e4   : > { %997 = vmatpush.bf16.msra.mxu0 %v1409_v42 }
 0x1e5   : > { %1010 = vmatpush.bf16.msra.mxu1 %v1417_v43 }
 0x1e7   : > { %1024 = vmatpush.bf16.msra.mxu2 %v1424_v44  ;;  %1037 = vmatpush.bf16.msra.mxu3 %v1432_v45 }
 0x1e8   : > { %998 = vmatpush.bf16.msra.mxu0 %v1408_v46 }
 0x1e9   : > { %1011 = vmatpush.bf16.msra.mxu1 %v1416_v47 }
 0x1ee   : > { %617 = vmatmul.bf16.gmra.mxu2 %v601_v49  ;;  %v1423_v49 = vld [vmem:[#allocation13 + $0x90] sm:$0xff] }
 0x1ef   : > { %1025 = vmatpush.bf16.msra.mxu2 %v1423_v49 }
 0x261   : > { %v613_v50 = vpop.f32.mrf.mxu2 }
 0x262   : > { %v624_v51 = vsel %vm623_vm12, %v613_v50, -inf }
 0x263   : > { %625 = vmax.xlane.f32.xlu1 %v624_v51  ;;  %v1407_v51 = vld [vmem:[#allocation13 + $0x10] sm:$0xff] }
 0x264   : > { %999 = vmatpush.bf16.msra.mxu0 %v1407_v51 }
 0x269   : > { %v615_v52 = vpop.f32.mrf.mxu2 }
 0x26a   : > { %v627_v53 = vsel %vm623_vm12, %v615_v52, -inf }
 0x26b   : > { %628 = vmax.xlane.f32.xlu1 %v627_v53  ;;  %v1422_v53 = vld [vmem:[#allocation13 + $0x88] sm:$0xff] }
 0x26c   : > { %1026 = vmatpush.bf16.msra.mxu2 %v1422_v53 }
 0x271   : > { %v618_v54 = vpop.f32.mrf.mxu2 }
 0x272   : > { %v630_v55 = vsel %vm623_vm12, %v618_v54, -inf }
 0x273   : > { %631 = vmax.xlane.f32.xlu2 %v630_v55  ;;  %v1406_v55 = vld [vmem:[#allocation13 + $0x8] sm:$0xff] }
 0x274   : > { %1000 = vmatpush.bf16.msra.mxu0 %v1406_v55 }
 0x279   : > { %v620_v56 = vpop.f32.mrf.mxu2 }
 0x27a   : > { %v633_v57 = vsel %vm623_vm12, %v620_v56, -inf }
 0x27b   : > { %634 = vmax.xlane.f32.xlu2 %v633_v57  ;;  %v1414_v57 = vld [vmem:[#allocation13 + $0x48] sm:$0xff] }
 0x2d6   : > { %v626_v58 = vpop.xlane.xlu1 %625 }
 0x2d7   : > { %v636_v59 = vsub.f32 %v613_v50, %v626_v58  ;;  %v1431_v50 = vld [vmem:[#allocation13 + $0xd0] sm:$0xff] }
 0x2d8   : > { %1038 = vmatpush.bf16.msra.mxu3 %v1431_v50 }
 0x2d9   : > { %v640_v60 = vmul.f32 1.442695, %v636_v59  ;;  %v1421_v59 = vld [vmem:[#allocation13 + $0x80] sm:$0xff] }
 0x2da   : > { %1027 = vmatpush.bf16.msra.mxu2 %v1421_v59 }
 0x2db   : > { %1551 = vpow2.f32 %v640_v60  ;;  %v1429_v60 = vld [vmem:[#allocation13 + $0xc0] sm:$0xff] }
 0x2de   : > { %v629_v61 = vpop.xlane.xlu1 %628 }
 0x2df   : > { %v637_v62 = vsub.f32 %v615_v52, %v629_v61  ;;  %v1415_v52 = vld [vmem:[#allocation13 + $0x50] sm:$0xff] }
 0x2e0   : > { %1012 = vmatpush.bf16.msra.mxu1 %v1415_v52 }
 0x2e1   : > { %v1552_v63 = vpop.eup %1551  ;;  %v642_v0 = vmul.f32 1.442695, %v637_v62  ;;  %v1405_v62 = vld [vmem:[#allocation13] sm:$0xff] }
 0x2e2   : > { %v648_v1 = vsel %vm623_vm12, %v1552_v63, 0.0  ;;  %1001 = vmatpush.bf16.msra.mxu0 %v1405_v62 }
 0x2e3   : > { %1553 = vpow2.f32 %v642_v0  ;;  %649 = vadd.xlane.f32.xlu0 %v648_v1 }
 0x2e4   : > { %1013 = vmatpush.bf16.msra.mxu1 %v1414_v57 }
 0x2e6   : > { %v632_v2 = vpop.xlane.xlu2 %631 }
 0x2e7   : > { %v638_v3 = vsub.f32 %v618_v54, %v632_v2  ;;  %v1430_v54 = vld [vmem:[#allocation13 + $0xc8] sm:$0xff] }
 0x2e8   : > { %1039 = vmatpush.bf16.msra.mxu3 %v1430_v54 }
 0x2e9   : > { %v1554_v4 = vpop.eup %1553  ;;  %v644_v5 = vmul.f32 1.442695, %v638_v3 }
 0x2ea   : > { %v651_v6 = vsel %vm623_vm12, %v1554_v4, 0.0 }
 0x2eb   : > { %1555 = vpow2.f32 %v644_v5  ;;  %652 = vadd.xlane.f32.xlu1 %v651_v6 }
 0x2ec   : > { %1040 = vmatpush.bf16.msra.mxu3 %v1429_v60 }
 0x2ee   : > { %v635_v7 = vpop.xlane.xlu2 %634 }
 0x2ef   : > { %v639_v8 = vsub.f32 %v620_v56, %v635_v7 }
 0x2f1   : > { %v1556_v9 = vpop.eup %1555  ;;  %v646_v10 = vmul.f32 1.442695, %v639_v8 }
 0x2f2   : > { %v654_v11 = vsel %vm623_vm12, %v1556_v9, 0.0 }
 0x2f3   : > { %1557 = vpow2.f32 %v646_v10  ;;  %655 = vadd.xlane.f32.xlu2 %v654_v11 }
 0x2f9   : > { %v1558_v12 = vpop.eup %1557 }
 0x2fa   : > { %v657_v13 = vsel %vm623_vm12, %v1558_v12, 0.0 }
 0x2fb   : > { %658 = vadd.xlane.f32.xlu0 %v657_v13 }
 0x356   : > { %v650_v14 = vpop.xlane.xlu0 %649 }
 0x357   : > { %1559 = vrcp.f32 %v650_v14 }
 0x35d   : > { %v1560_v16 = vpop.eup %1559 }
 0x35e   : > { %v653_v15 = vpop.xlane.xlu1 %652  ;;  %v664_v18 = vmul.f32 %v1560_v16, %v1552_v63  ;;  %v1413_v63 = vld [vmem:[#allocation13 + $0x40] sm:$0xff] }
 0x35f   : > { %1561 = vrcp.f32 %v653_v15  ;;  %1014 = vmatpush.bf16.msra.mxu1 %v1413_v63 }
 0x365   : > { %v1562_v17 = vpop.eup %1561 }
 0x366   : > { %v665_v19 = vmul.f32 %v1562_v17, %v1554_v4  ;;  %v656_v21 = vpop.xlane.xlu2 %655 }
 0x367   : > { %1563 = vrcp.f32 %v656_v21 }
 0x368   : > { %v668_v20 = vpack.c.bf16 %v665_v19, %v664_v18 }
 0x36a   : > { %1255 = vmatmul.msk.bf16.vlgmr.msrb.gmra.mxu3 %vm623_vm12, %v668_v20 }
 0x36d   : > { %v1564_v23 = vpop.eup %1563 }
 0x36e   : > { %v659_v22 = vpop.xlane.xlu0 %658  ;;  %v666_v25 = vmul.f32 %v1564_v23, %v1556_v9 }
 0x36f   : > { %1565 = vrcp.f32 %v659_v22 }
 0x375   : > { %v1566_v24 = vpop.eup %1565 }
 0x376   : > { %v667_v26 = vmul.f32 %v1566_v24, %v1558_v12 }
 0x378   : > { %v669_v27 = vpack.c.bf16 %v667_v26, %v666_v25 }
 0x37a   : > { %1256 = vmatmul.msk.bf16.gmra.mxu3 %vm623_vm12, %v669_v27 }
 0x3ed   : > { %v689_v48 = vpop.f32.mrf.mxu3 }
 0x3ee   : > { %v699_v56 = vpack.c.bf16 %v689_v48, %v689_v48 }
 0x3f0   : > { %v707_v0 = vunpack.c.l.b16 %v699_v56 }
 0x3f5   : > { %v691_v58 = vpop.f32.mrf.mxu3 }
 0x3f6   : > { %v700_v61 = vpack.c.bf16 %v691_v58, %v691_v58 }
 0x3f8   : > { %v708_v1 = vunpack.c.l.b16 %v700_v61 }
 0x3fa   : > { %v711_v2 = vpack.c.b16 %v708_v1, %v707_v0 }
 0x3fc   : > { %v714_v3 = vunpack.i.h.s16 %v711_v2 }
 0x3fd   : > { %v694_v4 = vpop.f32.mrf.mxu3 }
 0x3fe   : > { %v1257_v5 = vpack.c.b16 %v714_v3, %v711_v2  ;;  %v701_v8 = vpack.c.bf16 %v694_v4, %v694_v4 }
 0x400   : > { %v717_v6 = vunpack.i.h.s16 %v1257_v5  ;;  %v709_v11 = vunpack.c.l.b16 %v701_v8 }
 0x402   : > { %v1258_v7 = vpack.c.b16 %v717_v6, %v1257_v5 }
 0x404   : > { %790 = vst [vmem:[#allocation1] ss:$4 sm:$0xff] %v1258_v7 }
 0x405   : > { %v696_v9 = vpop.f32.mrf.mxu3 }
 0x406   : > { %v702_v10 = vpack.c.bf16 %v696_v9, %v696_v9 }
 0x408   : > { %v710_v12 = vunpack.c.l.b16 %v702_v10 }
 0x40a   : > { %v712_v13 = vpack.c.b16 %v710_v12, %v709_v11 }
 0x40c   : > { %v720_v14 = vunpack.i.h.s16 %v712_v13 }
 0x40e   : > { %v1259_v15 = vpack.c.b16 %v720_v14, %v712_v13 }
 0x410   : > { %v723_v16 = vunpack.i.h.s16 %v1259_v15 }
 0x412   : > { %v1260_v17 = vpack.c.b16 %v723_v16, %v1259_v15 }
 0x414   : > { %793 = vst [vmem:[#allocation1 + $0x1] ss:$4 sm:$0xff] %v1260_v17 }
 0x41b   : > { %v794_v18 = vld.sshfl [vmem:[#allocation1] sm:$0xff pattern:$0x73625140]  ;;  %v795_v19 = vld.sshfl [vmem:[#allocation1 + $0x8] sm:$0xff pattern:$0x73625140] }
 0x41c   : > { %1002 = vmatmul.bf16.vlgmr.msra.gmra.mxu0 %v794_v18  ;;  %1015 = vmatmul.bf16.vlgmr.msra.gmra.mxu1 %v795_v19  ;;  %v796_v20 = vld.sshfl [vmem:[#allocation1 + $0x10] sm:$0xff pattern:$0x73625140]  ;;  %v797_v21 = vld.sshfl [vmem:[#allocation1 + $0x18] sm:$0xff pattern:$0x73625140] }
 0x41d   : > { %1028 = vmatmul.bf16.vlgmr.msra.gmra.mxu2 %v796_v20  ;;  %1041 = vmatmul.bf16.vlgmr.msra.gmra.mxu3 %v797_v21 }
 0x499   : > { %v1003_v22 = vpop.f32.mrf.mxu0  ;;  %v1016_v23 = vpop.f32.mrf.mxu1 }
 0x49a   : > { %v1017_v24 = vadd.f32 %v1016_v23, %v1003_v22 }
 0x4a0   : > { %v1029_v25 = vpop.f32.mrf.mxu2  ;;  %v1042_v26 = vpop.f32.mrf.mxu3 }
 0x4a1   : > { %v1030_v27 = vadd.f32 %v1029_v25, %v1017_v24  ;;  %v1005_v28 = vpop.f32.mrf.mxu0  ;;  %v1018_v29 = vpop.f32.mrf.mxu1 }
 0x4a3   : > { %v1043_v30 = vadd.f32 %v1042_v26, %v1030_v27 }
 0x4a5   : > { %v1046_v31 = vpack.c.bf16 %v1043_v30, %v1043_v30 }
 0x4a7   : > { %1047 = vst [vmem:[%s346_s17] sm:$0xf] %v1046_v31 }
 0x4a8   : > { %v1031_v32 = vpop.f32.mrf.mxu2  ;;  %v1044_v33 = vpop.f32.mrf.mxu3 }
 0x4a9   : > { %1744 = shalt.err (!%p1741_p13)
}
 0x4aa   : > { %1455 = dma.vmem_to_hbm [thread:$0]  (%p1947_p0), %s1063_s18, 64, %s1065_s29, %s1049_s24  }
 0x4ab PF: > { %s1076_s30 = sand.u32 1, %s1787_s21   ;;  %p1475_p2 = pnand %p1191_p4, %p1954_p6 }
 0x4ac   : > { %s1077_s7 = scalar_lea.sflag [#allocation7], %s1076_s30 }
 0x4ad   : > { %p1476_p5 = pneg %p1475_p2 }
 0x4af   : > { %1782 = dma.done.wait (%p1476_p5), %s1077_s7, 64  }
 0x4b0   : > { %1784 = vsyncadd (%p1476_p5), %s1077_s7, 4294967232  ;;  %s24_s26 = sadd.s32 1, %s1807_s26   ;;  %s2066_s21 = smov %s1791_s22 }
 0x4b1   : > { %p21_p7 = scmp.ge.s32.totalorder %s24_s26, 4   ;;  %s2067_s22 = smov %s1795_s23 }
 0x4b2   : > { %s2068_s23 = smov %s1952_s11  ;;  %s2069_s24 = smov %s1803_s25 }
 0x4b3   : > { %s2070_s25 = smov %s2072_s19  ;;  %23 = sbr.rel (!%p21_p7) target bundleno = 8 (0x8), region = 111 }
 0x4b8   :  { %1083 = vsyncpa [#allocation6], 1 }
 0x4b9   :  { %1085 = vsyncpa [#allocation6 + $0x1], 1 }
 0x4ba   :  { %1086 = vsyncpa [#allocation9], 1 }
 0x4bb   :  { %1087 = vsyncpa [#allocation12], 1 }
 0x4bc   :  { %1088 = vsyncpa [#allocation7], 1 }
 0x4bd   :  { %1090 = vsyncpa [#allocation7 + $0x1], 1 }

</bundles_post_ra>
